<compile_context>
chip_gen: v6e
topology: v6e:2x2x1
jax: 0.10.0
libtpu: 0.0.40
codegen_flags: <defaults>
</compile_context>

<pallas_src>
import functools

import jax
import jax.numpy as jnp
import numpy as np
from jax.experimental import pallas as pl
from jax.experimental.pallas import tpu as pltpu


def _round_up(x, m):
    return ((x + m - 1) // m) * m


def adaptive_block_kernel(x_ref, h_ref, c_ref, v_ref,
                          wx_ref, wh_ref, wv_ref, wg_ref, ws_ref, wha_ref,
                          wmlp_ref, bmlp_ref,
                          out_ref, *, K):
    f32 = jnp.float32

    x3 = x_ref[...]                      # (Bb, T, IN)
    h3 = h_ref[...]                      # (Bb, T, H)
    c3 = c_ref[...]                      # (Bb, T, H)
    Vp = v_ref[...]                      # (Bb, KPc, H)  rows >= K are zero padding

    Bb, T, IN = x3.shape
    H = h3.shape[-1]
    KPc = Vp.shape[1]
    BT = Bb * T

    wx = wx_ref[...]                     # (IN, H)
    wh = wh_ref[...]                     # (H, H)
    wv = wv_ref[...]                     # (H, CP)
    wg = wg_ref[...]                     # (H, CP)
    ws = ws_ref[...]                     # (H, CP)
    wha = wha_ref[...]                   # (1, CP)
    wmlp = wmlp_ref[...]                 # (H, OUTP)  real cols already at [SOFF, SOFF+vocab)
    bmlp = bmlp_ref[...]                 # (1, OUTP)
    OUTP = wmlp.shape[-1]

    x2 = x3.reshape(BT, IN)
    h2 = h3.reshape(BT, H)

    # ---- Sentinel: s_t = sigmoid(x_t @ Wx + h_{t-1} @ Wh) * tanh(cell_t) ----
    xw3 = jnp.dot(x2, wx, preferred_element_type=f32).reshape(Bb, T, H)
    hw3 = jnp.dot(h2, wh, preferred_element_type=f32).reshape(Bb, T, H)
    if T > 1:
        # shift the (linear) matmul result by one step within each sequence; h_{-1} = 0
        hw_prev3 = jnp.concatenate(
            [jnp.zeros((Bb, 1, H), f32), hw3[:, :T - 1, :]], axis=1)
    else:
        hw_prev3 = jnp.zeros_like(hw3)
    gate3 = xw3 + hw_prev3
    s3 = jax.nn.sigmoid(gate3) * jnp.tanh(c3)
    s2 = s3.reshape(BT, H)

    # ---- Attention logits over the (padded) visual regions ----
    gW2 = jnp.dot(h2, wg, preferred_element_type=f32)                 # (BT, CP)
    gW3 = gW2.reshape(Bb, T, -1)
    vW3 = jnp.dot(Vp.reshape(Bb * KPc, H), wv,
                  preferred_element_type=f32).reshape(Bb, KPc, -1)    # (Bb, KPc, CP)

    content_v = vW3[:, None, :, :] + gW3[:, :, None, :]               # (Bb, T, KPc, CP)
    zraw3 = jnp.sum(jnp.tanh(content_v) * wha, axis=-1)               # (Bb, T, KPc)

    content_s = jnp.dot(s2, ws, preferred_element_type=f32) + gW2     # (BT, CP)
    zext3 = jnp.sum(jnp.tanh(content_s) * wha,
                    axis=-1, keepdims=True).reshape(Bb, T, 1)         # (Bb, T, 1)

    # ---- Softmaxes: regions only (alpha) and regions + sentinel (beta) ----
    NEG = jnp.float32(-1e30)
    col = jax.lax.broadcasted_iota(jnp.int32, zraw3.shape, 2)         # (Bb, T, KPc)
    zk = jnp.where(col < K, zraw3, NEG)                               # mask pad regions
    m = jnp.maximum(jnp.max(zk, axis=-1, keepdims=True), zext3)       # joint max
    ek = jnp.exp(zk - m)                                              # pad cols -> exactly 0
    es = jnp.exp(zext3 - m)                                           # single sentinel exp
    sum_k = jnp.sum(ek, axis=-1, keepdims=True)
    inv_k = pl.reciprocal(sum_k, approx=True)
    inv_x = pl.reciprocal(sum_k + es, approx=True)
    alpha3 = ek * inv_k                                               # (Bb, T, KPc)
    beta3 = es * inv_x                                                # (Bb, T, 1)

    # c_t = alpha @ V  (pad cols of alpha are 0, pad rows of V are 0)
    c_t3 = jnp.einsum('btk,bkh->bth', alpha3, Vp, preferred_element_type=f32)
    c_hat3 = beta3 * s3 + (1.0 - beta3) * c_t3                        # (Bb, T, H)

    # ---- Classifier: scores land directly at their lane offset via padded weights ----
    feat2 = (c_hat3 + h3).reshape(BT, H)
    scores3 = (jnp.dot(feat2, wmlp, preferred_element_type=f32)
               + bmlp).reshape(Bb, T, OUTP)                           # cols <SOFF are 0

    # ---- Single fused, lane-dense 128-wide output slab ----
    ab = jnp.where(col == K, beta3, alpha3)                           # alpha | beta at col K
    ab_wide = jnp.concatenate(
        [ab, jnp.zeros((Bb, T, OUTP - KPc), f32)], axis=-1)           # (Bb, T, OUTP)
    out_ref[...] = scores3 + ab_wide                                  # disjoint column merge


def _pick_block_b(B, T, IN, H, CP, KPc, OUTP, budget_bytes=24 << 20):
    """Largest divisor of B whose working set fits VMEM; prefer BT >= 128."""
    def cost(bb):
        bt = bb * T
        content_v = bt * KPc * CP * 4                       # dominant intermediate
        small = bt * (IN + 6 * H + 4 * CP + 3 * KPc + 2 * OUTP) * 4
        streams = 2 * bb * (T * (IN + 2 * H + OUTP) + KPc * H) * 4  # double-buffered tiles
        return 2 * content_v + small + streams

    divisors = [d for d in range(1, B + 1) if B % d == 0]
    fits = [d for d in divisors if cost(d) <= budget_bytes] or [1]
    # prefer a block reaching BT >= 128 while keeping >= 2 grid steps (v7x megacore) ...
    pref = [d for d in fits if d * T >= 128 and (B // d) >= 2]
    if pref:
        return pref[-1]
    # ... else BT >= 128 with a single grid step, else the largest block that fits.
    pref = [d for d in fits if d * T >= 128]
    if pref:
        return pref[-1]
    return fits[-1]


def adaptive_block(x, hiddens, cells, V, params, block_b=None):
    B, T, IN = x.shape
    H = hiddens.shape[-1]
    K = V.shape[1]
    C = params['wv_t'].shape[1]               # attention projection width (49)
    vocab = params['wmlp_t'].shape[1]

    CP = _round_up(C, 64)                     # lane width of attention projections
    KPc = _round_up(K + 1, 8)                 # sublane-padded region axis (+ sentinel slot)
    SOFF = KPc                                # lane offset of the scores in the fused slab
    OUTP = _round_up(SOFF + vocab, 128)       # fused, lane-dense output width

    if block_b is None:
        block_b = _pick_block_b(B, T, IN, H, CP, KPc, OUTP)
    assert B % block_b == 0, f"block_b={block_b} must divide batch={B}"
    nb = B // block_b

    # ---- one-time parameter prep (zero padding / column placement) ----
    def padcols(w, new):
        return jnp.pad(w, ((0, 0), (0, new - w.shape[1])))

    wv_p = padcols(params['wv_t'], CP)
    wg_p = padcols(params['wg_t'], CP)
    ws_p = padcols(params['ws_t'], CP)
    wha_p = padcols(params['wha'], CP)                                 # (1, CP)
    wmlp_p = jnp.zeros((H, OUTP), jnp.float32).at[:, SOFF:SOFF + vocab].set(
        params['wmlp_t'])                                              # (H, OUTP)
    bmlp_p = jnp.zeros((1, OUTP), jnp.float32).at[:, SOFF:SOFF + vocab].set(
        params['bmlp'])                                                # (1, OUTP)
    V_p = jnp.pad(V, ((0, 0), (0, KPc - K), (0, 0)))                   # (B, KPc, H)

    def batched(*tail):
        n = len(tail)
        return pl.BlockSpec((block_b,) + tail, lambda b, _n=n: (b,) + (0,) * _n)

    def shared(shape):
        n = len(shape)
        return pl.BlockSpec(shape, lambda b, _n=n: (0,) * _n)

    out = pl.pallas_call(
        functools.partial(adaptive_block_kernel, K=K),
        out_shape=jax.ShapeDtypeStruct((B, T, OUTP), jnp.float32),
        grid=(nb,),
        in_specs=[
            batched(T, IN),
            batched(T, H),
            batched(T, H),
            batched(KPc, H),
            shared(params['wx_t'].shape),
            shared(params['whs_t'].shape),
            shared(wv_p.shape),
            shared(wg_p.shape),
            shared(ws_p.shape),
            shared(wha_p.shape),
            shared(wmlp_p.shape),
            shared(bmlp_p.shape),
        ],
        out_specs=batched(T, OUTP),
        compiler_params=pltpu.CompilerParams(
            dimension_semantics=("parallel",),
            vmem_limit_bytes=32 * 1024 * 1024),
    )(x, hiddens, cells, V_p,
      params['wx_t'], params['whs_t'], wv_p, wg_p, ws_p, wha_p, wmlp_p, bmlp_p)

    scores = out[..., SOFF:SOFF + vocab]
    alpha = out[..., :K]
    beta = out[..., K:K + 1]
    return scores, alpha, beta


# ---------------- pure-JAX reference (for correctness check) ----------------
def reference(x, hiddens, cells, V, p):
    B, T, H = hiddens.shape
    h0 = jnp.zeros((B, 1, H), hiddens.dtype)
    h_prev = jnp.concatenate([h0, hiddens[:, :-1, :]], axis=1) if T > 1 else h0
    gate = x @ p['wx_t'] + h_prev @ p['whs_t']
    s_t = jax.nn.sigmoid(gate) * jnp.tanh(cells)
    vW = V @ p['wv_t']                                       # (B, K, 49)
    gW = hiddens @ p['wg_t']                                 # (B, T, 49)
    content_v = vW[:, None, :, :] + gW[:, :, None, :]        # (B, T, K, 49)
    z = jnp.sum(jnp.tanh(content_v) * p['wha'][0], axis=-1)  # (B, T, K)
    alpha = jax.nn.softmax(z, axis=-1)
    c_t = jnp.einsum('btk,bkh->bth', alpha, V)
    content_s = s_t @ p['ws_t'] + gW
    z_ext = jnp.sum(jnp.tanh(content_s) * p['wha'][0], axis=-1, keepdims=True)
    ext = jnp.concatenate([z, z_ext], axis=-1)
    alpha_hat = jax.nn.softmax(ext, axis=-1)
    beta = alpha_hat[..., -1:]
    c_hat = beta * s_t + (1.0 - beta) * c_t
    scores = (c_hat + hiddens) @ p['wmlp_t'] + p['bmlp'][0]
    return scores, alpha, beta


# ---------------- deterministic parameter init (PyTorch-style) ----------------
def xavier_uniform(key, out_f, in_f):
    bound = float(np.sqrt(6.0 / (in_f + out_f)))
    return jax.random.uniform(key, (out_f, in_f), jnp.float32, -bound, bound)


def kaiming_normal_fan_in(key, out_f, in_f):
    std = float(np.sqrt(2.0 / in_f))
    return jax.random.normal(key, (out_f, in_f), jnp.float32) * std


if __name__ == "__main__":
    B, T, E, H, K, VOCAB = 2, 8, 16, 32, 49, 40   # embed_size=16 -> x feature = 2E = 32
    key = jax.random.PRNGKey(0)
    keys = jax.random.split(key, 12)

    x = jax.random.normal(keys[0], (B, T, 2 * E), jnp.float32)
    hiddens = jax.random.normal(keys[1], (B, T, H), jnp.float32)
    cells = jax.random.normal(keys[2], (B, T, H), jnp.float32)
    V = jax.random.normal(keys[3], (B, K, H), jnp.float32)

    # PyTorch Linear weights are (out, in); build then transpose to (in, out).
    w_sent_x = xavier_uniform(keys[4], H, 2 * E)       # Sentinel.affine_x
    w_sent_h = xavier_uniform(keys[5], H, H)           # Sentinel.affine_h
    w_v = xavier_uniform(keys[6], 49, H)               # Atten.affine_v
    w_g = xavier_uniform(keys[7], 49, H)               # Atten.affine_g
    w_s = xavier_uniform(keys[8], 49, H)               # Atten.affine_s
    w_hatt = xavier_uniform(keys[9], 1, 49)            # Atten.affine_h
    w_mlp = kaiming_normal_fan_in(keys[10], VOCAB, H)  # mlp (kaiming_normal fan_in)
    b_mlp = jnp.zeros((VOCAB,), jnp.float32)           # bias filled with 0

    params = dict(
        wx_t=w_sent_x.T, whs_t=w_sent_h.T,
        wv_t=w_v.T, wg_t=w_g.T, ws_t=w_s.T,
        wha=w_hatt,                      # (1, 49)
        wmlp_t=w_mlp.T, bmlp=b_mlp.reshape(1, VOCAB),
    )

    scores, alpha, beta = adaptive_block(x, hiddens, cells, V, params)
    jax.block_until_ready((scores, alpha, beta))

    s_ref, a_ref, b_ref = reference(x, hiddens, cells, V, params)
    assert scores.shape == (B, T, VOCAB) and alpha.shape == (B, T, K) and beta.shape == (B, T, 1)
    # tolerances account for pl.reciprocal(approx=True) in the softmax denominators
    assert np.allclose(np.asarray(scores), np.asarray(s_ref), rtol=5e-3, atol=5e-3)
    assert np.allclose(np.asarray(alpha), np.asarray(a_ref), rtol=5e-3, atol=5e-3)
    assert np.allclose(np.asarray(beta), np.asarray(b_ref), rtol=5e-3, atol=5e-3)

    print("KERNEL_OK")
</pallas_src>

<mosaic_0001>
module attributes {stable_mosaic.version = 11 : i64} {
  func.func @adaptive_block_kernel(%arg0: i32, %arg1: memref<2x8x32xf32, #tpu.memory_space<vmem>>, %arg2: memref<2x8x32xf32, #tpu.memory_space<vmem>>, %arg3: memref<2x8x32xf32, #tpu.memory_space<vmem>>, %arg4: memref<2x56x32xf32, #tpu.memory_space<vmem>>, %arg5: memref<32x32xf32, #tpu.memory_space<vmem>>, %arg6: memref<32x32xf32, #tpu.memory_space<vmem>>, %arg7: memref<32x64xf32, #tpu.memory_space<vmem>>, %arg8: memref<32x64xf32, #tpu.memory_space<vmem>>, %arg9: memref<32x64xf32, #tpu.memory_space<vmem>>, %arg10: memref<1x64xf32, #tpu.memory_space<vmem>>, %arg11: memref<32x128xf32, #tpu.memory_space<vmem>>, %arg12: memref<1x128xf32, #tpu.memory_space<vmem>>, %arg13: memref<2x8x128xf32, #tpu.memory_space<vmem>>) attributes {dimension_semantics = [#tpu.dimension_semantics<parallel>], iteration_bounds = array<i64: 1>, scalar_prefetch = 0 : i64, scratch_operands = 0 : i64, tpu.core_type = #tpu.core_type<tc>, window_params = [{transform_indices = @transform_0, window_bounds = array<i64: 2, 8, 32>}, {transform_indices = @transform_1, window_bounds = array<i64: 2, 8, 32>}, {transform_indices = @transform_2, window_bounds = array<i64: 2, 8, 32>}, {transform_indices = @transform_3, window_bounds = array<i64: 2, 56, 32>}, {pipeline_mode = #tpu.pipeline_mode<synchronous>, transform_indices = @transform_4, window_bounds = array<i64: 32, 32>}, {pipeline_mode = #tpu.pipeline_mode<synchronous>, transform_indices = @transform_5, window_bounds = array<i64: 32, 32>}, {pipeline_mode = #tpu.pipeline_mode<synchronous>, transform_indices = @transform_6, window_bounds = array<i64: 32, 64>}, {pipeline_mode = #tpu.pipeline_mode<synchronous>, transform_indices = @transform_7, window_bounds = array<i64: 32, 64>}, {pipeline_mode = #tpu.pipeline_mode<synchronous>, transform_indices = @transform_8, window_bounds = array<i64: 32, 64>}, {pipeline_mode = #tpu.pipeline_mode<synchronous>, transform_indices = @transform_9, window_bounds = array<i64: 1, 64>}, {pipeline_mode = #tpu.pipeline_mode<synchronous>, transform_indices = @transform_10, window_bounds = array<i64: 32, 128>}, {pipeline_mode = #tpu.pipeline_mode<synchronous>, transform_indices = @transform_11, window_bounds = array<i64: 1, 128>}, {transform_indices = @transform_12, window_bounds = array<i64: 2, 8, 128>}]} {
    %c0 = arith.constant 0 : index
    %c0_0 = arith.constant 0 : index
    %c0_1 = arith.constant 0 : index
    %0 = vector.load %arg1[%c0, %c0_0, %c0_1] : memref<2x8x32xf32, #tpu.memory_space<vmem>>, vector<2x8x32xf32>
    %c0_2 = arith.constant 0 : index
    %c0_3 = arith.constant 0 : index
    %c0_4 = arith.constant 0 : index
    %1 = vector.load %arg2[%c0_2, %c0_3, %c0_4] : memref<2x8x32xf32, #tpu.memory_space<vmem>>, vector<2x8x32xf32>
    %c0_5 = arith.constant 0 : index
    %c0_6 = arith.constant 0 : index
    %c0_7 = arith.constant 0 : index
    %2 = vector.load %arg3[%c0_5, %c0_6, %c0_7] : memref<2x8x32xf32, #tpu.memory_space<vmem>>, vector<2x8x32xf32>
    %c0_8 = arith.constant 0 : index
    %c0_9 = arith.constant 0 : index
    %c0_10 = arith.constant 0 : index
    %3 = vector.load %arg4[%c0_8, %c0_9, %c0_10] : memref<2x56x32xf32, #tpu.memory_space<vmem>>, vector<2x56x32xf32>
    %c0_11 = arith.constant 0 : index
    %c0_12 = arith.constant 0 : index
    %4 = vector.load %arg5[%c0_11, %c0_12] : memref<32x32xf32, #tpu.memory_space<vmem>>, vector<32x32xf32>
    %c0_13 = arith.constant 0 : index
    %c0_14 = arith.constant 0 : index
    %5 = vector.load %arg6[%c0_13, %c0_14] : memref<32x32xf32, #tpu.memory_space<vmem>>, vector<32x32xf32>
    %c0_15 = arith.constant 0 : index
    %c0_16 = arith.constant 0 : index
    %6 = vector.load %arg7[%c0_15, %c0_16] : memref<32x64xf32, #tpu.memory_space<vmem>>, vector<32x64xf32>
    %c0_17 = arith.constant 0 : index
    %c0_18 = arith.constant 0 : index
    %7 = vector.load %arg8[%c0_17, %c0_18] : memref<32x64xf32, #tpu.memory_space<vmem>>, vector<32x64xf32>
    %c0_19 = arith.constant 0 : index
    %c0_20 = arith.constant 0 : index
    %8 = vector.load %arg9[%c0_19, %c0_20] : memref<32x64xf32, #tpu.memory_space<vmem>>, vector<32x64xf32>
    %c0_21 = arith.constant 0 : index
    %c0_22 = arith.constant 0 : index
    %9 = vector.load %arg10[%c0_21, %c0_22] : memref<1x64xf32, #tpu.memory_space<vmem>>, vector<1x64xf32>
    %c0_23 = arith.constant 0 : index
    %c0_24 = arith.constant 0 : index
    %10 = vector.load %arg11[%c0_23, %c0_24] : memref<32x128xf32, #tpu.memory_space<vmem>>, vector<32x128xf32>
    %c0_25 = arith.constant 0 : index
    %c0_26 = arith.constant 0 : index
    %11 = vector.load %arg12[%c0_25, %c0_26] : memref<1x128xf32, #tpu.memory_space<vmem>>, vector<1x128xf32>
    %12 = vector.shape_cast %0 : vector<2x8x32xf32> to vector<16x32xf32>
    %13 = vector.shape_cast %1 : vector<2x8x32xf32> to vector<16x32xf32>
    %cst = arith.constant dense<0.000000e+00> : vector<16x32xf32>
    %14 = tpu.matmul %12, %4, %cst {dimension_numbers = #tpu.dot_dimension_numbers<[1], [0], [0], [1], [0, 0, 1, 1], [], []>} : vector<16x32xf32>, vector<32x32xf32>, vector<16x32xf32> -> vector<16x32xf32>
    %15 = vector.shape_cast %14 : vector<16x32xf32> to vector<2x8x32xf32>
    %cst_27 = arith.constant dense<0.000000e+00> : vector<16x32xf32>
    %16 = tpu.matmul %13, %5, %cst_27 {dimension_numbers = #tpu.dot_dimension_numbers<[1], [0], [0], [1], [0, 0, 1, 1], [], []>} : vector<16x32xf32>, vector<32x32xf32>, vector<16x32xf32> -> vector<16x32xf32>
    %17 = vector.shape_cast %16 : vector<16x32xf32> to vector<2x8x32xf32>
    %cst_28 = arith.constant 0.000000e+00 : f32
    %18 = vector.broadcast %cst_28 : f32 to vector<2x1x32xf32>
    %19 = vector.extract_strided_slice %17 {offsets = [0, 0, 0], sizes = [2, 7, 32], strides = [1, 1, 1]} : vector<2x8x32xf32> to vector<2x7x32xf32>
    %20 = tpu.concatenate %18, %19 in 1 : vector<2x1x32xf32>, vector<2x7x32xf32> -> vector<2x8x32xf32>
    %21 = arith.addf %15, %20 : vector<2x8x32xf32>
    %22 = arith.negf %21 : vector<2x8x32xf32>
    %23 = math.exp %22 : vector<2x8x32xf32>
    %cst_29 = arith.constant 1.000000e+00 : f32
    %24 = vector.broadcast %cst_29 : f32 to vector<2x8x32xf32>
    %25 = arith.addf %24, %23 : vector<2x8x32xf32>
    %26 = arith.divf %24, %25 : vector<2x8x32xf32>
    %27 = math.tanh %2 : vector<2x8x32xf32>
    %28 = arith.mulf %26, %27 : vector<2x8x32xf32>
    %29 = vector.shape_cast %28 : vector<2x8x32xf32> to vector<16x32xf32>
    %cst_30 = arith.constant dense<0.000000e+00> : vector<16x64xf32>
    %30 = tpu.matmul %13, %7, %cst_30 {dimension_numbers = #tpu.dot_dimension_numbers<[1], [0], [0], [1], [0, 0, 1, 1], [], []>} : vector<16x32xf32>, vector<32x64xf32>, vector<16x64xf32> -> vector<16x64xf32>
    %31 = vector.shape_cast %30 : vector<16x64xf32> to vector<2x8x64xf32>
    %32 = vector.shape_cast %3 : vector<2x56x32xf32> to vector<112x32xf32>
    %cst_31 = arith.constant dense<0.000000e+00> : vector<112x64xf32>
    %33 = tpu.matmul %32, %6, %cst_31 {dimension_numbers = #tpu.dot_dimension_numbers<[1], [0], [0], [1], [0, 0, 1, 1], [], []>} : vector<112x32xf32>, vector<32x64xf32>, vector<112x64xf32> -> vector<112x64xf32>
    %34 = vector.shape_cast %33 : vector<112x64xf32> to vector<2x56x64xf32>
    %35 = vector.shape_cast %34 : vector<2x56x64xf32> to vector<2x1x56x64xf32>
    %36 = vector.shape_cast %31 : vector<2x8x64xf32> to vector<2x8x1x64xf32>
    %37 = vector.broadcast %35 : vector<2x1x56x64xf32> to vector<2x8x56x64xf32>
    %38 = vector.broadcast %36 : vector<2x8x1x64xf32> to vector<2x8x56x64xf32>
    %39 = arith.addf %37, %38 : vector<2x8x56x64xf32>
    %40 = math.tanh %39 : vector<2x8x56x64xf32>
    %41 = vector.shape_cast %9 : vector<1x64xf32> to vector<1x1x1x64xf32>
    %42 = vector.broadcast %41 : vector<1x1x1x64xf32> to vector<2x8x56x64xf32>
    %43 = arith.mulf %40, %42 : vector<2x8x56x64xf32>
    %cst_32 = arith.constant dense<0.000000e+00> : vector<2x8x56xf32>
    %44 = vector.multi_reduction <add>, %43, %cst_32 [3] : vector<2x8x56x64xf32> to vector<2x8x56xf32>
    %cst_33 = arith.constant dense<0.000000e+00> : vector<16x64xf32>
    %45 = tpu.matmul %29, %8, %cst_33 {dimension_numbers = #tpu.dot_dimension_numbers<[1], [0], [0], [1], [0, 0, 1, 1], [], []>} : vector<16x32xf32>, vector<32x64xf32>, vector<16x64xf32> -> vector<16x64xf32>
    %46 = arith.addf %45, %30 : vector<16x64xf32>
    %47 = math.tanh %46 : vector<16x64xf32>
    %48 = vector.broadcast %9 : vector<1x64xf32> to vector<16x64xf32>
    %49 = arith.mulf %47, %48 : vector<16x64xf32>
    %cst_34 = arith.constant dense<0.000000e+00> : vector<16xf32>
    %50 = vector.multi_reduction <add>, %49, %cst_34 [1] : vector<16x64xf32> to vector<16xf32>
    %51 = vector.shape_cast %50 : vector<16xf32> to vector<16x1xf32>
    %52 = vector.shape_cast %51 : vector<16x1xf32> to vector<2x8x1xf32>
    %53 = tpu.iota {dimensions = array<i32: 2>} : vector<2x8x56xi32>
    %c49_i32 = arith.constant 49 : i32
    %54 = vector.broadcast %c49_i32 : i32 to vector<2x8x56xi32>
    %55 = arith.cmpi slt, %53, %54 : vector<2x8x56xi32>
    %cst_35 = arith.constant -1.000000e+30 : f32
    %56 = vector.broadcast %cst_35 : f32 to vector<2x8x56xf32>
    %57 = arith.select %55, %44, %56 : vector<2x8x56xi1>, vector<2x8x56xf32>
    %cst_36 = arith.constant dense<0xFF800000> : vector<2x8xf32>
    %58 = vector.multi_reduction <maximumf>, %57, %cst_36 [2] : vector<2x8x56xf32> to vector<2x8xf32>
    %59 = vector.shape_cast %58 : vector<2x8xf32> to vector<2x8x1xf32>
    %60 = arith.maximumf %59, %52 : vector<2x8x1xf32>
    %61 = vector.broadcast %60 : vector<2x8x1xf32> to vector<2x8x56xf32>
    %62 = arith.subf %57, %61 : vector<2x8x56xf32>
    %63 = math.exp %62 : vector<2x8x56xf32>
    %64 = arith.subf %52, %60 : vector<2x8x1xf32>
    %65 = math.exp %64 : vector<2x8x1xf32>
    %cst_37 = arith.constant dense<0.000000e+00> : vector<2x8xf32>
    %66 = vector.multi_reduction <add>, %63, %cst_37 [2] : vector<2x8x56xf32> to vector<2x8xf32>
    %67 = vector.shape_cast %66 : vector<2x8xf32> to vector<2x8x1xf32>
    %68 = tpu.reciprocal %67 {approx = true} : vector<2x8x1xf32> -> vector<2x8x1xf32>
    %69 = arith.addf %67, %65 : vector<2x8x1xf32>
    %70 = tpu.reciprocal %69 {approx = true} : vector<2x8x1xf32> -> vector<2x8x1xf32>
    %71 = vector.broadcast %68 : vector<2x8x1xf32> to vector<2x8x56xf32>
    %72 = arith.mulf %63, %71 : vector<2x8x56xf32>
    %73 = arith.mulf %65, %70 : vector<2x8x1xf32>
    "tpu.trace_start"() <{level = 10 : i32, message = "btk,bkh->bth"}> : () -> ()
    %cst_38 = arith.constant dense<0.000000e+00> : vector<2x8x32xf32>
    %74 = tpu.matmul %72, %3, %cst_38 {dimension_numbers = #tpu.dot_dimension_numbers<[2], [1], [1], [2], [0, 0, 0, 1, 1, 2], [0], [0]>} : vector<2x8x56xf32>, vector<2x56x32xf32>, vector<2x8x32xf32> -> vector<2x8x32xf32>
    "tpu.trace_stop"() : () -> ()
    %75 = vector.broadcast %73 : vector<2x8x1xf32> to vector<2x8x32xf32>
    %76 = arith.mulf %75, %28 : vector<2x8x32xf32>
    %cst_39 = arith.constant 1.000000e+00 : f32
    %77 = vector.broadcast %cst_39 : f32 to vector<2x8x1xf32>
    %78 = arith.subf %77, %73 : vector<2x8x1xf32>
    %79 = vector.broadcast %78 : vector<2x8x1xf32> to vector<2x8x32xf32>
    %80 = arith.mulf %79, %74 : vector<2x8x32xf32>
    %81 = arith.addf %76, %80 : vector<2x8x32xf32>
    %82 = arith.addf %81, %1 : vector<2x8x32xf32>
    %83 = vector.shape_cast %82 : vector<2x8x32xf32> to vector<16x32xf32>
    %cst_40 = arith.constant dense<0.000000e+00> : vector<16x128xf32>
    %84 = tpu.matmul %83, %10, %cst_40 {dimension_numbers = #tpu.dot_dimension_numbers<[1], [0], [0], [1], [0, 0, 1, 1], [], []>} : vector<16x32xf32>, vector<32x128xf32>, vector<16x128xf32> -> vector<16x128xf32>
    %85 = vector.broadcast %11 : vector<1x128xf32> to vector<16x128xf32>
    %86 = arith.addf %84, %85 : vector<16x128xf32>
    %87 = vector.shape_cast %86 : vector<16x128xf32> to vector<2x8x128xf32>
    %c49_i32_41 = arith.constant 49 : i32
    %88 = vector.broadcast %c49_i32_41 : i32 to vector<2x8x56xi32>
    %89 = arith.cmpi eq, %53, %88 : vector<2x8x56xi32>
    %90 = vector.shape_cast %73 : vector<2x8x1xf32> to vector<2x8x1xf32>
    %91 = vector.broadcast %90 : vector<2x8x1xf32> to vector<2x8x56xf32>
    %92 = arith.select %89, %91, %72 : vector<2x8x56xi1>, vector<2x8x56xf32>
    %cst_42 = arith.constant 0.000000e+00 : f32
    %93 = vector.broadcast %cst_42 : f32 to vector<2x8x72xf32>
    %94 = tpu.concatenate %92, %93 in 2 : vector<2x8x56xf32>, vector<2x8x72xf32> -> vector<2x8x128xf32>
    %95 = arith.addf %87, %94 : vector<2x8x128xf32>
    %c0_43 = arith.constant 0 : index
    %c0_44 = arith.constant 0 : index
    %c0_45 = arith.constant 0 : index
    %96 = vector.load %arg13[%c0_43, %c0_44, %c0_45] : memref<2x8x128xf32, #tpu.memory_space<vmem>>, vector<2x8x128xf32>
    tpu.vector_store %arg13[%c0_43, %c0_44, %c0_45], %95 {strides = array<i32>} : memref<2x8x128xf32, #tpu.memory_space<vmem>>, vector<2x8x128xf32>,
    return
  }
  func.func @transform_0(%arg0: i32) -> (i32, i32, i32) {
    %c0_i32 = arith.constant 0 : i32
    %c0_i32_0 = arith.constant 0 : i32
    %c0_i32_1 = arith.constant 0 : i32
    return %arg0, %c0_i32, %c0_i32_0 : i32, i32, i32
  }
  func.func @transform_1(%arg0: i32) -> (i32, i32, i32) {
    %c0_i32 = arith.constant 0 : i32
    %c0_i32_0 = arith.constant 0 : i32
    %c0_i32_1 = arith.constant 0 : i32
    return %arg0, %c0_i32, %c0_i32_0 : i32, i32, i32
  }
  func.func @transform_2(%arg0: i32) -> (i32, i32, i32) {
    %c0_i32 = arith.constant 0 : i32
    %c0_i32_0 = arith.constant 0 : i32
    %c0_i32_1 = arith.constant 0 : i32
    return %arg0, %c0_i32, %c0_i32_0 : i32, i32, i32
  }
  func.func @transform_3(%arg0: i32) -> (i32, i32, i32) {
    %c0_i32 = arith.constant 0 : i32
    %c0_i32_0 = arith.constant 0 : i32
    %c0_i32_1 = arith.constant 0 : i32
    return %arg0, %c0_i32, %c0_i32_0 : i32, i32, i32
  }
  func.func @transform_4(%arg0: i32) -> (i32, i32) {
    %c0_i32 = arith.constant 0 : i32
    %c0_i32_0 = arith.constant 0 : i32
    %c0_i32_1 = arith.constant 0 : i32
    return %c0_i32, %c0_i32_0 : i32, i32
  }
  func.func @transform_5(%arg0: i32) -> (i32, i32) {
    %c0_i32 = arith.constant 0 : i32
    %c0_i32_0 = arith.constant 0 : i32
    %c0_i32_1 = arith.constant 0 : i32
    return %c0_i32, %c0_i32_0 : i32, i32
  }
  func.func @transform_6(%arg0: i32) -> (i32, i32) {
    %c0_i32 = arith.constant 0 : i32
    %c0_i32_0 = arith.constant 0 : i32
    %c0_i32_1 = arith.constant 0 : i32
    return %c0_i32, %c0_i32_0 : i32, i32
  }
  func.func @transform_7(%arg0: i32) -> (i32, i32) {
    %c0_i32 = arith.constant 0 : i32
    %c0_i32_0 = arith.constant 0 : i32
    %c0_i32_1 = arith.constant 0 : i32
    return %c0_i32, %c0_i32_0 : i32, i32
  }
  func.func @transform_8(%arg0: i32) -> (i32, i32) {
    %c0_i32 = arith.constant 0 : i32
    %c0_i32_0 = arith.constant 0 : i32
    %c0_i32_1 = arith.constant 0 : i32
    return %c0_i32, %c0_i32_0 : i32, i32
  }
  func.func @transform_9(%arg0: i32) -> (i32, i32) {
    %c0_i32 = arith.constant 0 : i32
    %c0_i32_0 = arith.constant 0 : i32
    %c0_i32_1 = arith.constant 0 : i32
    return %c0_i32, %c0_i32_0 : i32, i32
  }
  func.func @transform_10(%arg0: i32) -> (i32, i32) {
    %c0_i32 = arith.constant 0 : i32
    %c0_i32_0 = arith.constant 0 : i32
    %c0_i32_1 = arith.constant 0 : i32
    return %c0_i32, %c0_i32_0 : i32, i32
  }
  func.func @transform_11(%arg0: i32) -> (i32, i32) {
    %c0_i32 = arith.constant 0 : i32
    %c0_i32_0 = arith.constant 0 : i32
    %c0_i32_1 = arith.constant 0 : i32
    return %c0_i32, %c0_i32_0 : i32, i32
  }
  func.func @transform_12(%arg0: i32) -> (i32, i32, i32) {
    %c0_i32 = arith.constant 0 : i32
    %c0_i32_0 = arith.constant 0 : i32
    %c0_i32_1 = arith.constant 0 : i32
    return %arg0, %c0_i32, %c0_i32_0 : i32, i32, i32
  }
}

</mosaic_0001>

<bundles_post_ra>
// kernel: tpu_custom_call.1
= control target key start
LH: loop header
LB: loop body
LE: loop exit
PB: predicated region body
PF: predicated region fallthrough
CT: control target
= control target key end

     0   :  { %17 = vsyncpa [#allocation3], 0  ;;  %s4452_s0 = inlined_call_operand.hbm [shape: f32[2,8,32], index: 0, kind: input, shape index: {}]   ;;  %s4453_s1 = inlined_call_operand.hbm [shape: f32[2,8,32], index: 1, kind: input, shape index: {}]   ;;  %s4454_s2 = inlined_call_operand.hbm [shape: f32[2,8,32], index: 2, kind: input, shape index: {}]   ;;  %s4455_s3 = inlined_call_operand.vmem [shape: f32[2,56,32], index: 3, kind: input, shape index: {}]   ;;  %s4456_s4 = inlined_call_operand.vmem [shape: f32[32,32], index: 4, kind: input, shape index: {}]   ;;  %s4457_s5 = inlined_call_operand.vmem [shape: f32[32,32], index: 5, kind: input, shape index: {}]   ;;  %s4458_s6 = inlined_call_operand.vmem [shape: f32[32,64], index: 6, kind: input, shape index: {}]   ;;  %s4459_s7 = inlined_call_operand.vmem [shape: f32[32,64], index: 7, kind: input, shape index: {}]   ;;  %s4460_s8 = inlined_call_operand.vmem [shape: f32[32,64], index: 8, kind: input, shape index: {}]   ;;  %s4461_s9 = inlined_call_operand.vmem [shape: f32[1,64], index: 9, kind: input, shape index: {}]   ;;  %s4462_s10 = inlined_call_operand.vmem [shape: f32[32,128], index: 10, kind: input, shape index: {}]   ;;  %s4463_s11 = inlined_call_operand.vmem [shape: f32[1,128], index: 11, kind: input, shape index: {}]   ;;  %s4464_s12 = inlined_call_operand.hbm [shape: f32[2,8,128], index: 12, kind: output, shape index: {}]  }
   0x1   :  { %18 = vsyncpa [#allocation6], 0 }
   0x2   :  { %19 = vsyncpa [#allocation4], 0  ;;  %s3104_s21 = smov [#allocation5]   ;;  %s3105_s23 = smov [#allocation2]  }
   0x3   :  { %s37_s22 = sshll.u32 %s3104_s21, 4  ;;  %s25_s24 = sshll.u32 %s3105_s23, 4  ;;  %s38_s22 = int_to_ptr.vmem [resolvable:$true] %s37_s22  ;;  %s26_s24 = int_to_ptr.vmem [resolvable:$true] %s25_s24 }
   0x4   :  { %s3026_s25 = scalar_lea.vmem %s38_s22, 256  ;;  %p3031_p1 = scmp.lt.s32.totalorder %s38_s22, %s38_s22 }
   0x5   :  { %p3027_p0 = scmp.ne.s32.totalorder %s38_s22, %s3026_s25  ;;  %p3032_p2 = scmp.lt.s32.totalorder %s3026_s25, %s3026_s25 }
   0x7   :  { %p3033_p3 = por %p3032_p2, %p3031_p1 }
   0x9   :  { %p3034_p4 = pnand %p3033_p3, %p3027_p0 }
   0xb   :  { %3037 = shalt.err (!%p3034_p4)
}
   0xc   :  { %s3106_s26 = smov 128   ;;  %s3107_s27 = smov 8  }
   0xd   :  { %43 = dma.hbm_to_vmem [thread:$0]  %s4453_s1, 256, %s38_s22, [#allocation6], %s3106_s26, %s3106_s26, %s3107_s27  }
   0xe   :  { %s3046_s30 = scalar_lea.vmem %s26_s24, 256  ;;  %p3051_p6 = scmp.lt.s32.totalorder %s26_s24, %s26_s24 }
   0xf   :  { %p3047_p5 = scmp.ne.s32.totalorder %s26_s24, %s3046_s30  ;;  %p3052_p7 = scmp.lt.s32.totalorder %s3046_s30, %s3046_s30 }
  0x11   :  { %p3053_p8 = por %p3052_p7, %p3051_p6 }
  0x13   :  { %p3054_p9 = pnand %p3053_p8, %p3047_p5 }
  0x15   :  { %3057 = shalt.err (!%p3054_p9)
}
  0x16   :  { %31 = dma.hbm_to_vmem [thread:$0]  %s4452_s0, 256, %s26_s24, [#allocation3], %s3106_s26, %s3106_s26, %s3107_s27  }
  0x17   :  { %s3108_s15 = smov [#allocation7]  }
  0x18   :  { %s49_s16 = sshll.u32 %s3108_s15, 4  ;;  %s50_s16 = int_to_ptr.vmem [resolvable:$true] %s49_s16 }
  0x19   :  { %s3066_s17 = scalar_lea.vmem %s50_s16, 256  ;;  %p3071_p11 = scmp.lt.s32.totalorder %s50_s16, %s50_s16 }
  0x1a   :  { %p3067_p10 = scmp.ne.s32.totalorder %s50_s16, %s3066_s17  ;;  %p3072_p12 = scmp.lt.s32.totalorder %s3066_s17, %s3066_s17 }
  0x1c   :  { %p3073_p13 = por %p3072_p12, %p3071_p11 }
  0x1e   :  { %p3074_p0 = pnand %p3073_p13, %p3067_p10 }
  0x20   :  { %3077 = shalt.err (!%p3074_p0)
}
  0x21   :  { %55 = dma.hbm_to_vmem [thread:$0]  %s4454_s2, 256, %s50_s16, [#allocation6], %s3106_s26, %s3106_s26, %s3107_s27  }
  0x22   :  { %3098 = dma.done.wait [#allocation3], 256  }
  0x23   :  { %3099 = vsyncadd [#allocation3], 4294967040 }
  0x24   :  { %3100 = dma.done.wait [#allocation6], 512  }
  0x25   :  { %3101 = vsyncadd [#allocation6], 4294966784  ;;  %v106_v0 = vld [vmem:[%s4456_s4 + $0x18] sm:$0xff]  ;;  %v105_v2 = vld [vmem:[%s4456_s4 + $0x10] sm:$0xff]  ;;  %vm129_vm0 = vcmask 261120   ;;  %vm298_vm1 = vcmask 1040384   ;;  %v577_v46 = vlaneseq }
  0x26   :  { %v110_v1 = vld [vmem:[%s4457_s5 + $0x18] sm:$0xff]  ;;  %2618 = vmatprep.subr.mxu0 %v106_v0  ;;  %v109_v3 = vld [vmem:[%s4457_s5 + $0x10] sm:$0xff]  ;;  %v104_v4 = vld [vmem:[%s4456_s4 + $0x8] sm:$0xff]  ;;  %v3109_v44 = vmov 1966171168   ;;  %vm1093_vm2 = vcmask 523264  }
  0x27   :  { %2629 = vmatprep.subr.mxu1 %v110_v1  ;;  %2619 = vmatpush3.msra.mxu0 %v106_v0  ;;  %v108_v5 = vld [vmem:[%s4457_s5 + $0x8] sm:$0xff]  ;;  %v103_v6 = vld [vmem:[%s4456_s4] sm:$0xff]  ;;  %v85_v9 = vld [vmem:[#allocation5] sm:$0xff]  ;;  %v575_v45 = vunpack.c.l.s4 %v3109_v44  ;;  %v3319_v53 = vshrl.u32 %v577_v46, 7  ;;  %vm1645_vm3 = vcmask 130112   ;;  %vm1652_vm4 = vcmask 195712  }
  0x28   :  { %2630 = vmatpush3.msra.mxu1 %v110_v1  ;;  %2620 = vmatprep.subr.mxu0 %v105_v2  ;;  %v107_v7 = vld [vmem:[%s4457_s5] sm:$0xff]  ;;  %v84_v10 = vld [vmem:[#allocation2 + $0x8] sm:$0xff]  ;;  %v86_v11 = vld [vmem:[#allocation5 + $0x8] sm:$0xff]  ;;  %vm1659_vm5 = vcmask 261312   ;;  %vm1666_vm6 = vcmask 326912   ;;  %vm1673_vm7 = vcmask 392512  }
  0x29   :  { %2631 = vmatprep.subr.mxu1 %v109_v3  ;;  %2621 = vmatpush3.msra.mxu0 %v105_v2  ;;  %v83_v8 = vld [vmem:[#allocation2] sm:$0xff]  ;;  %v118_v12 = vld [vmem:[%s4459_s7 + $0x18] sm:$0xff]  ;;  %v117_v14 = vld [vmem:[%s4459_s7 + $0x10] sm:$0xff]  ;;  %v576_v52 = vunpack.c.0.s8 %v575_v45  ;;  %vm1680_vm8 = vcmask 458112   ;;  %vm2192_vm9 = vcmask 1041409   ;;  %vm2194_vm10 = vcmask 1042434  }
  0x2a   :  { %2632 = vmatpush3.msra.mxu1 %v109_v3  ;;  %2622 = vmatprep.subr.mxu0 %v104_v4  ;;  %v114_v13 = vld [vmem:[%s4458_s6 + $0x18] sm:$0xff]  ;;  %v113_v15 = vld [vmem:[%s4458_s6 + $0x10] sm:$0xff]  ;;  %v116_v16 = vld [vmem:[%s4459_s7 + $0x8] sm:$0xff]  ;;  %vm2196_vm11 = vcmask 1043459   ;;  %vm2198_vm12 = vcmask 1044484   ;;  %vm2200_vm13 = vcmask 1045509  }
  0x2b   :  { %2633 = vmatprep.subr.mxu1 %v108_v5  ;;  %2623 = vmatpush3.msra.mxu0 %v104_v4  ;;  %v112_v17 = vld [vmem:[%s4458_s6 + $0x8] sm:$0xff]  ;;  %v115_v18 = vld [vmem:[%s4459_s7] sm:$0xff]  ;;  %v91_v22 = vld [vmem:[%s4455_s3 + $0x10] sm:$0xff]  ;;  %v3324_v56 = vsub.s32 %v576_v52, %v3319_v53  ;;  %v3344_v4 = vsub.s32 0, %v3319_v53  ;;  %vm2202_vm14 = vcmask 1046534   ;;  %vm2204_vm15 = vcmask 1047559  }
  0x2c   :  { %2634 = vmatpush3.msra.mxu1 %v108_v5  ;;  %2624 = vmatprep.subr.mxu0 %v103_v6  ;;  %v111_v19 = vld [vmem:[%s4458_s6] sm:$0xff]  ;;  %v90_v21 = vld [vmem:[%s4455_s3 + $0x8] sm:$0xff]  ;;  %v92_v23 = vld [vmem:[%s4455_s3 + $0x18] sm:$0xff]  ;;  %s3112_s15 = smov [#allocation8]  }
  0x2d   :  { %2635 = vmatprep.subr.mxu1 %v107_v7  ;;  %2625 = vmatpush3.msra.mxu0 %v103_v6  ;;  %v89_v20 = vld [vmem:[%s4455_s3] sm:$0xff]  ;;  %v94_v25 = vld [vmem:[%s4455_s3 + $0x28] sm:$0xff]  ;;  %v95_v26 = vld [vmem:[%s4455_s3 + $0x30] sm:$0xff]  ;;  %s2511_s7 = sshll.u32 %s3112_s15, 4  ;;  %s2512_s7 = int_to_ptr.vmem [resolvable:$true] %s2511_s7 }
  0x2e   :  { %2626 = vmatprep.mubr.msk.f32.mxu0 %vm129_vm0, %v83_v8  ;;  %2636 = vmatpush3.msra.mxu1 %v107_v7  ;;  %v93_v24 = vld [vmem:[%s4455_s3 + $0x20] sm:$0xff]  ;;  %v96_v27 = vld [vmem:[%s4455_s3 + $0x38] sm:$0xff]  ;;  %v98_v29 = vld [vmem:[%s4455_s3 + $0x48] sm:$0xff]  ;;  %s3078_s16 = scalar_lea.vmem %s2512_s7, 256  ;;  %p3083_p2 = scmp.lt.s32.totalorder %s2512_s7, %s2512_s7 }
  0x2f   :  { %2637 = vmatprep.mubr.msk.f32.mxu1 %vm129_vm0, %v85_v9  ;;  %2627 = vmatmul.mubr.msk.f32.vlgmr.msra.gmra.mxu0 %vm129_vm0, %v84_v10  ;;  %v97_v28 = vld [vmem:[%s4455_s3 + $0x40] sm:$0xff]  ;;  %v99_v30 = vld [vmem:[%s4455_s3 + $0x50] sm:$0xff]  ;;  %v100_v31 = vld [vmem:[%s4455_s3 + $0x58] sm:$0xff]  ;;  %p3079_p1 = scmp.ne.s32.totalorder %s2512_s7, %s3078_s16  ;;  %p3084_p3 = scmp.lt.s32.totalorder %s3078_s16, %s3078_s16 }
  0x30   :  { %2638 = vmatmul.mubr.msk.f32.vlgmr.msra.gmra.mxu1 %vm129_vm0, %v86_v11  ;;  %2640 = vmatprep.subr.mxu0 %v118_v12  ;;  %v101_v32 = vld [vmem:[%s4455_s3 + $0x60] sm:$0xff]  ;;  %v102_v33 = vld [vmem:[%s4455_s3 + $0x68] sm:$0xff]  ;;  %v122_v34 = vld [vmem:[%s4460_s8 + $0x18] sm:$0xff] }
  0x31   :  { %2651 = vmatprep.subr.mxu1 %v114_v13  ;;  %2641 = vmatpush3.msra.mxu0 %v118_v12  ;;  %v121_v35 = vld [vmem:[%s4460_s8 + $0x10] sm:$0xff]  ;;  %v120_v36 = vld [vmem:[%s4460_s8 + $0x8] sm:$0xff]  ;;  %v119_v37 = vld [vmem:[%s4460_s8] sm:$0xff]  ;;  %p3085_p4 = por %p3084_p3, %p3083_p2 }
  0x32   :  { %2652 = vmatpush3.msra.mxu1 %v114_v13  ;;  %2642 = vmatprep.subr.mxu0 %v117_v14  ;;  %v87_v13 = vld [vmem:[#allocation7] sm:$0xff] }
  0x33   :  { %2653 = vmatprep.subr.mxu1 %v113_v15  ;;  %2643 = vmatpush3.msra.mxu0 %v117_v14  ;;  %p3086_p5 = pnand %p3085_p4, %p3079_p1 }
  0x34   :  { %2654 = vmatpush3.msra.mxu1 %v113_v15  ;;  %2644 = vmatprep.subr.mxu0 %v116_v16 }
  0x35   :  { %2655 = vmatprep.subr.mxu1 %v112_v17  ;;  %2645 = vmatpush3.msra.mxu0 %v116_v16 }
  0x36   :  { %2656 = vmatpush3.msra.mxu1 %v112_v17  ;;  %2646 = vmatprep.subr.mxu0 %v115_v18 }
  0x37   :  { %2657 = vmatprep.subr.mxu1 %v111_v19  ;;  %2647 = vmatpush3.msra.mxu0 %v115_v18 }
  0x38   :  { %2648 = vmatprep.mubr.msk.f32.mxu0 %vm129_vm0, %v85_v9  ;;  %2658 = vmatpush3.msra.mxu1 %v111_v19 }
  0x39   :  { %2659 = vmatprep.mubr.msk.f32.mxu1 %vm129_vm0, %v89_v20  ;;  %2649 = vmatmul.mubr.msk.f32.vlgmr.msra.gmra.mxu0 %vm129_vm0, %v86_v11  ;;  %v88_v11 = vld [vmem:[#allocation7 + $0x8] sm:$0xff] }
  0x3a   :  { %2660 = vmatmul.mubr.msk.f32.vlgmr.msra.gmra.mxu1 %vm129_vm0, %v90_v21  ;;  %2680 = vmatprep.subr.mxu0 %v122_v34 }
  0x3b   :  { %2662 = vmatprep.mubr.msk.f32.mxu1 %vm129_vm0, %v91_v22  ;;  %2681 = vmatpush3.msra.mxu0 %v122_v34 }
  0x3c   :  { %2682 = vmatprep.subr.mxu0 %v121_v35 }
  0x3d   :  { %2683 = vmatpush3.msra.mxu0 %v121_v35 }
  0x3e   :  { %2663 = vmatmul.mubr.msk.f32.gmra.mxu1 %vm129_vm0, %v92_v23  ;;  %2684 = vmatprep.subr.mxu0 %v120_v36 }
  0x3f   :  { %2665 = vmatprep.mubr.msk.f32.mxu1 %vm129_vm0, %v93_v24  ;;  %2685 = vmatpush3.msra.mxu0 %v120_v36 }
  0x40   :  { %2686 = vmatprep.subr.mxu0 %v119_v37 }
  0x41   :  { %2687 = vmatpush3.msra.mxu0 %v119_v37 }
  0x42   :  { %2666 = vmatmul.mubr.msk.f32.gmra.mxu1 %vm129_vm0, %v94_v25 }
  0x43   :  { %2668 = vmatprep.mubr.msk.f32.mxu1 %vm129_vm0, %v95_v26 }
  0x46   :  { %2669 = vmatmul.mubr.msk.f32.gmra.mxu1 %vm129_vm0, %v96_v27 }
  0x47   :  { %2671 = vmatprep.mubr.msk.f32.mxu1 %vm129_vm0, %v97_v28 }
  0x4a   :  { %2672 = vmatmul.mubr.msk.f32.gmra.mxu1 %vm129_vm0, %v98_v29 }
  0x4b   :  { %2674 = vmatprep.mubr.msk.f32.mxu1 %vm129_vm0, %v99_v30 }
  0x4e   :  { %2675 = vmatmul.mubr.msk.f32.gmra.mxu1 %vm129_vm0, %v100_v31 }
  0x4f   :  { %2677 = vmatprep.mubr.msk.f32.mxu1 %vm129_vm0, %v101_v32 }
  0x52   :  { %2678 = vmatmul.mubr.msk.f32.gmra.mxu1 %vm129_vm0, %v102_v33 }
  0xef   :  { %v2628_v39 = vpop.f32.mrf.mxu0 }
  0xf0   :  { %v2639_v38 = vpop.f32.mrf.mxu1 }
  0xf1   :  { %v295_v40 = vrot.slane %v2639_v38, 7  ;;  %v202_v48 = vpop.f32.mrf.mxu0 }
  0xf2   :  { %v283_v41 = vpop.f32.mrf.mxu1 }
  0xf3   :  { %v300_v42 = vsel %vm298_vm1, 0.0, %v295_v40  ;;  %v294_v43 = vrot.slane %v283_v41, 7 }
  0xf4   :  { %v302_v47 = vadd.f32 %v2628_v39, %v300_v42 }
  0xf5   :  { %v299_v49 = vsel %vm298_vm1, 0.0, %v294_v43 }
  0xf6   :  { %v2529_v50 = vmul.f32 -1.442695, %v302_v47  ;;  %v301_v51 = vadd.f32 %v299_v49, %v202_v48  ;;  %v3416_v47 = vld [vmem:[%s4461_s9] ss:$0 sm:$0xff] }
  0xf8   :  { %2745 = vpow2.f32 %v2529_v50  ;;  %v2528_v54 = vmul.f32 -1.442695, %v301_v51 }
  0xf9   :  { %v3321_v55 = vpop.f32.mrf.mxu0 }
  0xfa   :  { %2747 = vpow2.f32 %v2528_v54  ;;  %v622_v57 = vcombine.high %v3321_v55, %v3321_v55  ;;  %v3331_v60 = vpop.f32.mrf.mxu1 }
  0xfb   :  { %v3328_v58 = vpop.f32.mrf.mxu0  ;;  %2749 = vtanh.f32 %v88_v11 }
  0xfc   :  { %v636_v59 = vrot.slane %v622_v57, %v3324_v56  ;;  %v580_v61 = vrot.slane %v3328_v58, %v3324_v56  ;;  %v573_v0 = vcombine.high %v3328_v58, %v3328_v58  ;;  %v3347_v6 = vpop.f32.mrf.mxu1  ;;  %2751 = vtanh.f32 %v87_v13 }
  0xfe   :  { %v638_v62 = vcombine.high %v636_v59, %v636_v59  ;;  %v3336_v63 = vrot.slane %v636_v59, %v3324_v56  ;;  %v588_v1 = vcombine.high %v580_v61, %v580_v61  ;;  %v596_v5 = vrot.slane %v580_v61, %v3324_v56  ;;  %v3365_v17 = vpop.f32.mrf.mxu1 }
  0xff   :  { %v587_v10 = vrot.slane %v573_v0, %v3324_v56 }
 0x100   :  { %v666_v2 = vrot.slane %v638_v62, %v3324_v56  ;;  %v668_v3 = vcombine.high %v3336_v63, %v3336_v63  ;;  %v3357_v12 = vrot.slane %v588_v1, %v3324_v56  ;;  %v3363_v16 = vrot.slane %v596_v5, %v3344_v4  ;;  %v3374_v25 = vpop.f32.mrf.mxu1 }
 0x101   :  { %v603_v21 = vrot.slane %v587_v10, %v3324_v56  ;;  %v618_v22 = vcombine.high %v596_v5, %v596_v5  ;;  %v589_v29 = vcombine.high %v587_v10, %v587_v10 }
 0x102   :  { %v670_v7 = vcombine.high %v666_v2, %v666_v2  ;;  %v3350_v8 = vrot.slane %v666_v2, %v3344_v4  ;;  %v3353_v9 = vrot.slane %v668_v3, %v3344_v4  ;;  %v3369_v19 = vrot.slane %v3357_v12, %v3344_v4  ;;  %v3394_v36 = vpop.f32.mrf.mxu1 }
 0x103   :  { %v751_v23 = vadd.f32 %v3363_v16, %v3347_v6  ;;  %v752_v27 = vadd.f32 %v3331_v60, %v3363_v16  ;;  %v753_v30 = vadd.f32 %v3363_v16, %v3374_v25  ;;  %v619_v31 = vcombine.high %v603_v21, %v603_v21 }
 0x104   :  { %v3360_v15 = vrot.slane %v670_v7, %v3344_v4  ;;  %v758_v26 = vadd.f32 %v3369_v19, %v3347_v6  ;;  %v759_v28 = vadd.f32 %v3331_v60, %v3369_v19  ;;  %v3385_v32 = vrot.slane %v618_v22, %v3344_v4  ;;  %v3411_v45 = vpop.f32.mrf.mxu1 }
 0x105   :  { %v2746_v14 = vpop.eup %2745  ;;  %v760_v33 = vadd.f32 %v3369_v19, %v3374_v25  ;;  %v754_v34 = vadd.f32 %v3365_v17, %v3363_v16  ;;  %v3392_v35 = vrot.slane %v589_v29, %v3324_v56  ;;  %v3397_v37 = vrot.slane %v619_v31, %v3344_v4 }
 0x106   :  { %v310_v18 = vadd.f32 1.0, %v2746_v14  ;;  %v766_v38 = vadd.f32 %v3331_v60, %v3385_v32  ;;  %v756_v39 = vadd.f32 %v3394_v36, %v3363_v16  ;;  %v761_v42 = vadd.f32 %v3365_v17, %v3369_v19 }
 0x107   :  { %v2748_v20 = vpop.eup %2747  ;;  %v621_v40 = vcombine.high %v3392_v35, %v3392_v35  ;;  %v3409_v43 = vadd.f32 %v3397_v37, %v3347_v6  ;;  %v765_v48 = vadd.f32 %v3385_v32, %v3347_v6  ;;  %v3421_v51 = vrot.slane %v603_v21, %v3344_v4 }
 0x108   :  { %2753 = vrcp.f32 %v310_v18  ;;  %v309_v24 = vadd.f32 1.0, %v2748_v20  ;;  %v2750_v41 = vpop.eup %2749  ;;  %v755_v59 = vadd.f32 %v3363_v16, %v3411_v45  ;;  %v3431_v61 = vadd.f32 %v3331_v60, %v3397_v37 }
 0x109   :  { %2755 = vtanh.f32 %v751_v23  ;;  %v2752_v44 = vpop.eup %2751  ;;  %v3424_v52 = vrot.slane %v621_v40, %v3344_v4  ;;  %v767_v1 = vadd.f32 %v3385_v32, %v3374_v25  ;;  %v3439_v2 = vadd.f32 %v3397_v37, %v3411_v45 }
 0x10a   :  { %2757 = vrcp.f32 %v309_v24  ;;  %v3447_v11 = vadd.f32 %v3397_v37, %v3374_v25  ;;  %v3454_v18 = vadd.f32 %v3394_v36, %v3397_v37  ;;  %v3458_v20 = vadd.f32 %v3365_v17, %v3397_v37 }
 0x10b   :  { %2759 = vtanh.f32 %v758_v26  ;;  %v768_v24 = vadd.f32 %v3365_v17, %v3385_v32  ;;  %v780_v40 = vadd.f32 %v3331_v60, %v3421_v51 }
 0x10c   :  { %2761 = vtanh.f32 %v752_v27  ;;  %v762_v27 = vadd.f32 %v3369_v19, %v3411_v45 }
 0x10d   :  { %2763 = vtanh.f32 %v759_v28 }
 0x10e   :  { %2765 = vtanh.f32 %v753_v30  ;;  %v3472_v30 = vadd.f32 %v3424_v52, %v3347_v6 }
 0x10f   :  { %2767 = vtanh.f32 %v760_v33 }
 0x110   :  { %2769 = vtanh.f32 %v754_v34 }
 0x111   :  { %2771 = vtanh.f32 %v766_v38  ;;  %v779_v38 = vadd.f32 %v3421_v51, %v3347_v6 }
 0x112   :  { %2773 = vtanh.f32 %v756_v39 }
 0x113   :  { %2775 = vtanh.f32 %v761_v42 }
 0x114   :  { %2777 = vtanh.f32 %v765_v48 }
 0x115   :  { %v2754_v49 = vpop.eup %2753  ;;  %2779 = vtanh.f32 %v755_v59 }
 0x116   :  { %v2756_v50 = vpop.eup %2755  ;;  %v3443_v10 = vmul.f32 %v2754_v49, %v2750_v41  ;;  %2781 = vtanh.f32 %v767_v1  ;;  %v3488_v49 = vadd.f32 %v3331_v60, %v3424_v52  ;;  %v3498_v1 = vadd.f32 %v3365_v17, %v3424_v52 }
 0x117   :  { %v2758_v54 = vpop.eup %2757  ;;  %v981_v57 = vmul.f32 %v2756_v50, %v3416_v47  ;;  %2783 = vtanh.f32 %v768_v24 }
 0x118   :  { %v2760_v62 = vpop.eup %2759  ;;  %v3433_v0 = vmul.f32 %v2758_v54, %v2752_v44  ;;  %2785 = vtanh.f32 %v762_v27  ;;  %v3484_v44 = vadd.f32 %v3424_v52, %v3374_v25  ;;  %v3513_v27 = vadd.f32 %v3424_v52, %v3411_v45 }
 0x119   :  { %v2762_v3 = vpop.eup %2761  ;;  %v1094_v5 = vsel %vm1093_vm2, %v981_v57, 0.0  ;;  %v988_v7 = vmul.f32 %v2760_v62, %v3416_v47  ;;  %2787 = vtanh.f32 %v779_v38  ;;  %v763_v57 = vadd.f32 %v3394_v36, %v3369_v19 }
 0x11a   :  { %v2764_v13 = vpop.eup %2763  ;;  %1095 = vadd.xlane.f32.xlu0 %v1094_v5  ;;  %v982_v14 = vmul.f32 %v2762_v3, %v3416_v47  ;;  %2688 = vmatprep.mubr.msk.f32.mxu0 %vm129_vm0, %v3433_v0  ;;  %v629_v62 = vrot.slane %v3321_v55, %v3324_v56  ;;  %2789 = vtanh.f32 %v780_v40  ;;  %v782_v40 = vadd.f32 %v3365_v17, %v3421_v51 }
 0x11b   :  { %v2766_v21 = vpop.eup %2765  ;;  %v1115_v22 = vsel %vm1093_vm2, %v988_v7, 0.0  ;;  %v989_v23 = vmul.f32 %v2764_v13, %v3416_v47  ;;  %2689 = vmatmul.mubr.msk.f32.vlgmr.msra.gmra.mxu0 %vm129_vm0, %v3443_v10  ;;  %v769_v13 = vadd.f32 %v3385_v32, %v3411_v45  ;;  %2791 = vtanh.f32 %v763_v57 }
 0x11c   :  { %v2768_v26 = vpop.eup %2767  ;;  %1116 = vadd.xlane.f32.xlu1 %v1115_v22  ;;  %v1097_v28 = vsel %vm1093_vm2, %v982_v14, 0.0  ;;  %v983_v29 = vmul.f32 %v2766_v21, %v3416_v47  ;;  %v620_v14 = vcombine.high %v3357_v12, %v3357_v12 }
 0x11d   :  { %v2770_v31 = vpop.eup %2769  ;;  %v1118_v33 = vsel %vm1093_vm2, %v989_v23, 0.0  ;;  %v990_v34 = vmul.f32 %v2768_v26, %v3416_v47  ;;  %v770_v23 = vadd.f32 %v3394_v36, %v3385_v32  ;;  %v645_v26 = vrot.slane %v629_v62, %v3324_v56 }
 0x11e   :  { %1098 = vadd.xlane.f32.xlu0 %v1097_v28  ;;  %v2772_v39 = vpop.eup %2771  ;;  %v1100_v41 = vsel %vm1093_vm2, %v983_v29, 0.0  ;;  %v984_v42 = vmul.f32 %v2770_v31, %v3416_v47  ;;  %2793 = vtanh.f32 %v769_v13  ;;  %v781_v29 = vadd.f32 %v3421_v51, %v3374_v25 }
 0x11f   :  { %v2774_v48 = vpop.eup %2773  ;;  %v1121_v50 = vsel %vm1093_vm2, %v990_v34, 0.0  ;;  %v996_v54 = vmul.f32 %v2772_v39, %v3416_v47  ;;  %v3524_v34 = vadd.f32 %v3394_v36, %v3424_v52  ;;  %2795 = vtanh.f32 %v770_v23 }
 0x120   :  { %1119 = vadd.xlane.f32.xlu1 %v1118_v33  ;;  %v2776_v59 = vpop.eup %2775  ;;  %v1103_v5 = vsel %vm1093_vm2, %v984_v42, 0.0  ;;  %v986_v7 = vmul.f32 %v2774_v48, %v3416_v47  ;;  %v3520_v33 = vrot.slane %v620_v14, %v3344_v4  ;;  %v667_v42 = vcombine.high %v645_v26, %v645_v26 }
 0x121   :  { %v2778_v3 = vpop.eup %2777  ;;  %v1139_v21 = vsel %vm1093_vm2, %v996_v54, 0.0  ;;  %v991_v22 = vmul.f32 %v2776_v59, %v3416_v47  ;;  %2797 = vtanh.f32 %v781_v29  ;;  %v783_v54 = vadd.f32 %v3421_v51, %v3411_v45 }
 0x122   :  { %1101 = vadd.xlane.f32.xlu0 %v1100_v41  ;;  %v2780_v24 = vpop.eup %2779  ;;  %v1109_v28 = vsel %vm1093_vm2, %v986_v7, 0.0  ;;  %v995_v12 = vmul.f32 %v2778_v3, %v3416_v47  ;;  %v637_v59 = vcombine.high %v629_v62, %v629_v62  ;;  %2799 = vtanh.f32 %v782_v40 }
 0x123   :  { %v2782_v31 = vpop.eup %2781  ;;  %v1124_v38 = vsel %vm1093_vm2, %v991_v22, 0.0  ;;  %v985_v39 = vmul.f32 %v2780_v24, %v3416_v47  ;;  %v772_v7 = vadd.f32 %v3520_v33, %v3347_v6  ;;  %v3539_v14 = vrot.slane %v667_v42, %v3344_v4 }
 0x124   :  { %1122 = vadd.xlane.f32.xlu1 %v1121_v50  ;;  %v2784_v41 = vpop.eup %2783  ;;  %v1136_v48 = vsel %vm1093_vm2, %v995_v12, 0.0  ;;  %v997_v50 = vmul.f32 %v2782_v31, %v3416_v47  ;;  %2801 = vtanh.f32 %v783_v54  ;;  %v784_v23 = vadd.f32 %v3394_v36, %v3421_v51 }
 0x125   :  { %v2786_v57 = vpop.eup %2785  ;;  %v1106_v3 = vsel %vm1093_vm2, %v985_v39, 0.0  ;;  %v3549_v12 = vrot.slane %v645_v26, %v3344_v4  ;;  %2803 = vtanh.f32 %v772_v7 }
 0x126   :  { %1104 = vadd.xlane.f32.xlu0 %v1103_v5  ;;  %v998_v5 = vmul.f32 %v2784_v41, %v3416_v47  ;;  %v2788_v13 = vpop.eup %2787  ;;  %v1142_v22 = vsel %vm1093_vm2, %v997_v50, 0.0  ;;  %v992_v62 = vmul.f32 %v2786_v57, %v3416_v47  ;;  %2805 = vtanh.f32 %v784_v23 }
 0x127   :  { %v2790_v24 = vpop.eup %2789  ;;  %v1009_v31 = vmul.f32 %v2788_v13, %v3416_v47  ;;  %v775_v57 = vadd.f32 %v3365_v17, %v3520_v33 }
 0x128   :  { %1140 = vadd.xlane.f32.xlu1 %v1139_v21  ;;  %v3541_v21 = vpop.f32.mrf.mxu1  ;;  %v1145_v29 = vsel %vm1093_vm2, %v998_v5, 0.0  ;;  %v2792_v39 = vpop.eup %2791  ;;  %v1127_v40 = vsel %vm1093_vm2, %v992_v62, 0.0  ;;  %v1010_v41 = vmul.f32 %v2790_v24, %v3416_v47  ;;  %v3580_v24 = vrot.slane %v3336_v63, %v3344_v4 }
 0x129   :  { %v1178_v50 = vsel %vm1093_vm2, %v1009_v31, 0.0  ;;  %v993_v54 = vmul.f32 %v2792_v39, %v3416_v47 }
 0x12a   :  { %1110 = vadd.xlane.f32.xlu0 %v1109_v28  ;;  %v659_v28 = vrot.slane %v637_v59, %v3324_v56  ;;  %v807_v56 = vadd.f32 %v3541_v21, %v3549_v12  ;;  %v835_v63 = vadd.f32 %v3541_v21, %v3580_v24 }
 0x12b   :  { %v2794_v26 = vpop.eup %2793  ;;  %v1130_v13 = vsel %vm1093_vm2, %v993_v54, 0.0  ;;  %v774_v54 = vadd.f32 %v3520_v33, %v3374_v25 }
 0x12c   :  { %1125 = vadd.xlane.f32.xlu1 %v1124_v38  ;;  %v821_v38 = vadd.f32 %v3541_v21, %v3539_v14  ;;  %v3560_v42 = vrot.slane %v659_v28, %v3344_v4  ;;  %v2796_v59 = vpop.eup %2795  ;;  %v999_v5 = vmul.f32 %v2794_v26, %v3416_v47 }
 0x12e   :  { %1137 = vadd.xlane.f32.xlu0 %v1136_v48  ;;  %v3564_v48 = vrot.slane %v3392_v35, %v3344_v4  ;;  %2807 = vtanh.f32 %v821_v38  ;;  %v814_v35 = vadd.f32 %v3541_v21, %v3560_v42  ;;  %v2798_v7 = vpop.eup %2797  ;;  %v773_v38 = vadd.f32 %v3331_v60, %v3520_v33 }
 0x12f   :  { %2809 = vtanh.f32 %v807_v56  ;;  %v2800_v23 = vpop.eup %2799  ;;  %v1011_v31 = vmul.f32 %v2798_v7, %v3416_v47 }
 0x130   :  { %1107 = vadd.xlane.f32.xlu1 %v1106_v3  ;;  %v1181_v3 = vsel %vm1093_vm2, %v1010_v41, 0.0  ;;  %2811 = vtanh.f32 %v775_v57  ;;  %v786_v62 = vadd.f32 %v3564_v48, %v3347_v6  ;;  %v1012_v6 = vmul.f32 %v2800_v23, %v3416_v47 }
 0x131   :  { %2813 = vtanh.f32 %v814_v35  ;;  %v2802_v39 = vpop.eup %2801  ;;  %v1184_v26 = vsel %vm1093_vm2, %v1011_v31, 0.0  ;;  %v777_v23 = vadd.f32 %v3394_v36, %v3520_v33 }
 0x132   :  { %1143 = vadd.xlane.f32.xlu0 %v1142_v22  ;;  %v1000_v22 = vmul.f32 %v2796_v59, %v3416_v47  ;;  %2815 = vtanh.f32 %v786_v62  ;;  %v2804_v56 = vpop.eup %2803  ;;  %v1187_v59 = vsel %vm1093_vm2, %v1012_v6, 0.0 }
 0x133   :  { %2817 = vtanh.f32 %v773_v38 }
 0x134   :  { %1146 = vadd.xlane.f32.xlu1 %v1145_v29  ;;  %v1148_v29 = vsel %vm1093_vm2, %v999_v5, 0.0  ;;  %v1151_v41 = vsel %vm1093_vm2, %v1000_v22, 0.0  ;;  %2819 = vtanh.f32 %v835_v63 }
 0x135   :  { %2821 = vtanh.f32 %v774_v54 }
 0x136   :  { %1128 = vadd.xlane.f32.xlu0 %v1127_v40  ;;  %v669_v40 = vcombine.high %v659_v28, %v659_v28  ;;  %v2806_v28 = vpop.eup %2805  ;;  %2823 = vtanh.f32 %v3409_v43  ;;  %v789_v43 = vadd.f32 %v3365_v17, %v3564_v48  ;;  %v849_v17 = vadd.f32 %v3541_v21, %v3353_v9 }
 0x137   :  { %v1014_v7 = vmul.f32 %v2806_v28, %v3416_v47 }
 0x138   :  { %1179 = vadd.xlane.f32.xlu1 %v1178_v50  ;;  %v1013_v50 = vmul.f32 %v2802_v39, %v3416_v47  ;;  %v3595_v57 = vrot.slane %v669_v40, %v3344_v4  ;;  %v787_v39 = vadd.f32 %v3331_v60, %v3564_v48  ;;  %v776_v60 = vadd.f32 %v3520_v33, %v3411_v45 }
 0x139   :  { %v1193_v31 = vsel %vm1093_vm2, %v1014_v7, 0.0 }
 0x13a   :  { %1182 = vadd.xlane.f32.xlu0 %v1181_v3  ;;  %v1002_v3 = vmul.f32 %v2804_v56, %v3416_v47  ;;  %v1190_v35 = vsel %vm1093_vm2, %v1013_v50, 0.0 }
 0x13b   :  { %v2808_v5 = vpop.eup %2807 }
 0x13c   :  { %1131 = vadd.xlane.f32.xlu1 %v1130_v13  ;;  %v828_v13 = vadd.f32 %v3541_v21, %v3595_v57  ;;  %v2810_v22 = vpop.eup %2809  ;;  %v1157_v4 = vsel %vm1093_vm2, %v1002_v3, 0.0  ;;  %v1051_v62 = vmul.f32 %v2808_v5, %v3416_v47 }
 0x13d   :  { %v1037_v38 = vmul.f32 %v2810_v22, %v3416_v47 }
 0x13e   :  { %1149 = vadd.xlane.f32.xlu0 %v1148_v29  ;;  %v2812_v29 = vpop.eup %2811  ;;  %2825 = vtanh.f32 %v828_v13 }
 0x13f   :  { %v2814_v40 = vpop.eup %2813  ;;  %v1005_v6 = vmul.f32 %v2812_v29, %v3416_v47  ;;  %2827 = vtanh.f32 %v777_v23  ;;  %v1262_v56 = vsel %vm1093_vm2, %v1037_v38, 0.0 }
 0x140   :  { %1152 = vadd.xlane.f32.xlu1 %v1151_v41  ;;  %v1304_v41 = vsel %vm1093_vm2, %v1051_v62, 0.0  ;;  %v2816_v63 = vpop.eup %2815  ;;  %2829 = vtanh.f32 %v787_v39  ;;  %v856_v39 = vadd.f32 %v3541_v21, %v3360_v15 }
 0x141   :  { %v2818_v50 = vpop.eup %2817  ;;  %v1166_v54 = vsel %vm1093_vm2, %v1005_v6, 0.0  ;;  %v1016_v28 = vmul.f32 %v2816_v63, %v3416_v47  ;;  %2831 = vtanh.f32 %v789_v43  ;;  %v842_v6 = vadd.f32 %v3541_v21, %v3350_v8 }
 0x142   :  { %1185 = vadd.xlane.f32.xlu0 %v1184_v26  ;;  %v1044_v26 = vmul.f32 %v2814_v40, %v3416_v47  ;;  %v1003_v5 = vmul.f32 %v2818_v50, %v3416_v47  ;;  %2833 = vtanh.f32 %v776_v60 }
 0x143   :  { %v1199_v13 = vsel %vm1093_vm2, %v1016_v28, 0.0  ;;  %2835 = vtanh.f32 %v849_v17  ;;  %v3650_v17 = vpop.f32.mrf.mxu1 }
 0x144   :  { %1188 = vadd.xlane.f32.xlu1 %v1187_v59  ;;  %v2820_v59 = vpop.eup %2819  ;;  %v1283_v3 = vsel %vm1093_vm2, %v1044_v26, 0.0  ;;  %v1160_v23 = vsel %vm1093_vm2, %v1003_v5, 0.0 }
 0x145   :  { %v2822_v7 = vpop.eup %2821  ;;  %v1065_v22 = vmul.f32 %v2820_v59, %v3416_v47 }
 0x146   :  { %1191 = vadd.xlane.f32.xlu0 %v1190_v35  ;;  %v788_v35 = vadd.f32 %v3564_v48, %v3374_v25  ;;  %v2824_v62 = vpop.eup %2823  ;;  %v1004_v29 = vmul.f32 %v2822_v7, %v3416_v47 }
 0x147   :  { %v1346_v25 = vsel %vm1093_vm2, %v1065_v22, 0.0  ;;  %v1023_v38 = vmul.f32 %v2824_v62, %v3416_v47 }
 0x148   :  { %1158 = vadd.xlane.f32.xlu1 %v1157_v4  ;;  %v790_v4 = vadd.f32 %v3564_v48, %v3411_v45  ;;  %2837 = vtanh.f32 %v788_v35  ;;  %v1163_v45 = vsel %vm1093_vm2, %v1004_v29, 0.0 }
 0x149   :  { %v1220_v63 = vsel %vm1093_vm2, %v1023_v38, 0.0 }
 0x14a   :  { %1194 = vadd.xlane.f32.xlu0 %v1193_v31  ;;  %2839 = vtanh.f32 %v790_v4 }
 0x14b   :  { %v2826_v31 = vpop.eup %2825  ;;  %2841 = vtanh.f32 %v3431_v61 }
 0x14c   :  { %1305 = vadd.xlane.f32.xlu1 %v1304_v41  ;;  %v2828_v40 = vpop.eup %2827  ;;  %v1058_v41 = vmul.f32 %v2826_v31, %v3416_v47  ;;  %2843 = vtanh.f32 %v856_v39  ;;  %v778_v39 = vadd.f32 %v3520_v33, %v3650_v17 }
 0x14d   :  { %v2830_v43 = vpop.eup %2829  ;;  %2845 = vtanh.f32 %v842_v6 }
 0x14e   :  { %1263 = vadd.xlane.f32.xlu0 %v1262_v56  ;;  %v1007_v56 = vmul.f32 %v2828_v40, %v3416_v47  ;;  %v2832_v26 = vpop.eup %2831  ;;  %v1325_v60 = vsel %vm1093_vm2, %v1058_v41, 0.0  ;;  %v1017_v50 = vmul.f32 %v2830_v43, %v3416_v47  ;;  %2847 = vtanh.f32 %v3439_v2 }
 0x14f   :  { %v1019_v21 = vmul.f32 %v2832_v26, %v3416_v47  ;;  %2849 = vtanh.f32 %v3447_v11  ;;  %v757_v2 = vadd.f32 %v3363_v16, %v3650_v17  ;;  %v791_v11 = vadd.f32 %v3394_v36, %v3564_v48 }
 0x150   :  { %1167 = vadd.xlane.f32.xlu1 %v1166_v54  ;;  %v2834_v54 = vpop.eup %2833  ;;  %v1172_v61 = vsel %vm1093_vm2, %v1007_v56, 0.0  ;;  %v1202_v59 = vsel %vm1093_vm2, %v1017_v50, 0.0  ;;  %2851 = vtanh.f32 %v3454_v18  ;;  %v785_v50 = vadd.f32 %v3421_v51, %v3650_v17  ;;  %v3696_v51 = vpop.f32.mrf.mxu1 }
 0x151   :  { %v2836_v28 = vpop.eup %2835  ;;  %v1208_v35 = vsel %vm1093_vm2, %v1019_v21, 0.0  ;;  %2853 = vtanh.f32 %v3458_v20  ;;  %v764_v20 = vadd.f32 %v3369_v19, %v3650_v17  ;;  %v771_v19 = vadd.f32 %v3385_v32, %v3650_v17 }
 0x152   :  { %1284 = vadd.xlane.f32.xlu0 %v1283_v3  ;;  %v1006_v3 = vmul.f32 %v2834_v54, %v3416_v47  ;;  %v1079_v7 = vmul.f32 %v2836_v28, %v3416_v47  ;;  %2855 = vtanh.f32 %v757_v2 }
 0x153   :  { %2857 = vtanh.f32 %v791_v11 }
 0x154   :  { %1200 = vadd.xlane.f32.xlu1 %v1199_v13  ;;  %v1169_v22 = vsel %vm1093_vm2, %v1006_v3, 0.0  ;;  %2859 = vtanh.f32 %v3472_v30 }
 0x155   :  { %v2838_v5 = vpop.eup %2837  ;;  %2861 = vtanh.f32 %v764_v20 }
 0x156   :  { %1161 = vadd.xlane.f32.xlu0 %v1160_v23  ;;  %v1018_v4 = vmul.f32 %v2838_v5, %v3416_v47  ;;  %v1388_v23 = vsel %vm1093_vm2, %v1079_v7, 0.0  ;;  %2863 = vtanh.f32 %v778_v39 }
 0x157   :  { %v2840_v13 = vpop.eup %2839  ;;  %2865 = vtanh.f32 %v771_v19 }
 0x158   :  { %1347 = vadd.xlane.f32.xlu1 %v1346_v25  ;;  %v2842_v62 = vpop.eup %2841  ;;  %v1020_v18 = vmul.f32 %v2840_v13, %v3416_v47  ;;  %v1205_v16 = vsel %vm1093_vm2, %v1018_v4, 0.0  ;;  %2867 = vtanh.f32 %v3484_v44  ;;  %v799_v44 = vadd.f32 %v3397_v37, %v3650_v17 }
 0x159   :  { %v2844_v29 = vpop.eup %2843  ;;  %v1024_v31 = vmul.f32 %v2842_v62, %v3416_v47  ;;  %2869 = vtanh.f32 %v3488_v49  ;;  %v792_v49 = vadd.f32 %v3564_v48, %v3650_v17  ;;  %v809_v37 = vadd.f32 %v3696_v51, %v3549_v12 }
 0x15a   :  { %1164 = vadd.xlane.f32.xlu0 %v1163_v45  ;;  %v2846_v25 = vpop.eup %2845  ;;  %v1211_v36 = vsel %vm1093_vm2, %v1020_v18, 0.0  ;;  %v1086_v38 = vmul.f32 %v2844_v29, %v3416_v47  ;;  %2871 = vtanh.f32 %v785_v50  ;;  %v823_v18 = vadd.f32 %v3696_v51, %v3539_v14 }
 0x15b   :  { %v2848_v40 = vpop.eup %2847  ;;  %v1223_v45 = vsel %vm1093_vm2, %v1024_v31, 0.0  ;;  %v1072_v41 = vmul.f32 %v2846_v25, %v3416_v47  ;;  %2873 = vtanh.f32 %v3498_v1 }
 0x15c   :  { %1221 = vadd.xlane.f32.xlu1 %v1220_v63  ;;  %v2850_v6 = vpop.eup %2849  ;;  %v1409_v43 = vsel %vm1093_vm2, %v1086_v38, 0.0  ;;  %v1027_v63 = vmul.f32 %v2848_v40, %v3416_v47  ;;  %2875 = vtanh.f32 %v799_v44  ;;  %v837_v38 = vadd.f32 %v3696_v51, %v3580_v24 }
 0x15d   :  { %v2852_v30 = vpop.eup %2851  ;;  %v1367_v33 = vsel %vm1093_vm2, %v1072_v41, 0.0  ;;  %v1025_v56 = vmul.f32 %v2850_v6, %v3416_v47  ;;  %2877 = vtanh.f32 %v792_v49 }
 0x15e   :  { %1326 = vadd.xlane.f32.xlu0 %v1325_v60  ;;  %v2854_v26 = vpop.eup %2853  ;;  %v1232_v60 = vsel %vm1093_vm2, %v1027_v63, 0.0  ;;  %v1028_v32 = vmul.f32 %v2852_v30, %v3416_v47  ;;  %2879 = vtanh.f32 %v809_v37  ;;  %v3729_v30 = vpop.f32.mrf.mxu1 }
 0x15f   :  { %v2856_v54 = vpop.eup %2855  ;;  %v1026_v21 = vmul.f32 %v2854_v26, %v3416_v47  ;;  %2881 = vtanh.f32 %v3513_v27  ;;  %v806_v27 = vadd.f32 %v3424_v52, %v3650_v17  ;;  %v816_v52 = vadd.f32 %v3696_v51, %v3560_v42 }
 0x160   :  { %1173 = vadd.xlane.f32.xlu1 %v1172_v61  ;;  %v1226_v61 = vsel %vm1093_vm2, %v1025_v56, 0.0  ;;  %v2858_v28 = vpop.eup %2857  ;;  %v987_v3 = vmul.f32 %v2856_v54, %v3416_v47  ;;  %2883 = vtanh.f32 %v823_v18  ;;  %v843_v18 = vadd.f32 %v3350_v8, %v3729_v30 }
 0x161   :  { %v2860_v5 = vpop.eup %2859  ;;  %v1021_v7 = vmul.f32 %v2858_v28, %v3416_v47  ;;  %2885 = vtanh.f32 %v3524_v34 }
 0x162   :  { %1203 = vadd.xlane.f32.xlu0 %v1202_v59  ;;  %v1235_v59 = vsel %vm1093_vm2, %v1028_v32, 0.0  ;;  %v2862_v2 = vpop.eup %2861  ;;  %v1112_v13 = vsel %vm1093_vm2, %v987_v3, 0.0  ;;  %2887 = vtanh.f32 %v837_v38  ;;  %v815_v3 = vadd.f32 %v3560_v42, %v3729_v30 }
 0x163   :  { %v2864_v4 = vpop.eup %2863  ;;  %v1214_v11 = vsel %vm1093_vm2, %v1021_v7, 0.0  ;;  %v994_v62 = vmul.f32 %v2862_v2, %v3416_v47  ;;  %2889 = vtanh.f32 %v806_v27  ;;  %v844_v7 = vadd.f32 %v3696_v51, %v3350_v8 }
 0x164   :  { %1209 = vadd.xlane.f32.xlu1 %v1208_v35  ;;  %v1229_v35 = vsel %vm1093_vm2, %v1026_v21, 0.0  ;;  %v2866_v1 = vpop.eup %2865 }
 0x165   :  { %v2868_v29 = vpop.eup %2867  ;;  %v1001_v31 = vmul.f32 %v2866_v1, %v3416_v47 }
 0x166   :  { %1170 = vadd.xlane.f32.xlu0 %v1169_v22  ;;  %v1030_v22 = vmul.f32 %v2860_v5, %v3416_v47  ;;  %v2870_v20 = vpop.eup %2869 }
 0x167   :  { %v2872_v39 = vpop.eup %2871  ;;  %v1154_v40 = vsel %vm1093_vm2, %v1001_v31, 0.0 }
 0x168   :  { %1389 = vadd.xlane.f32.xlu1 %v1388_v23  ;;  %v1241_v48 = vsel %vm1093_vm2, %v1030_v22, 0.0  ;;  %v1008_v23 = vmul.f32 %v2864_v4, %v3416_v47  ;;  %v2874_v41 = vpop.eup %2873  ;;  %v1015_v6 = vmul.f32 %v2872_v39, %v3416_v47  ;;  %v829_v22 = vadd.f32 %v3595_v57, %v3729_v30 }
 0x169   :  { %v2876_v63 = vpop.eup %2875  ;;  %v1033_v34 = vmul.f32 %v2874_v41, %v3416_v47  ;;  %v836_v41 = vadd.f32 %v3580_v24, %v3729_v30 }
 0x16a   :  { %1206 = vadd.xlane.f32.xlu0 %v1205_v16  ;;  %v1133_v16 = vsel %vm1093_vm2, %v994_v62, 0.0  ;;  %v1175_v25 = vsel %vm1093_vm2, %v1008_v23, 0.0  ;;  %v2878_v17 = vpop.eup %2877  ;;  %v1196_v56 = vsel %vm1093_vm2, %v1015_v6, 0.0  ;;  %v1029_v26 = vmul.f32 %v2876_v63, %v3416_v47 }
 0x16b   :  { %v2880_v32 = vpop.eup %2879  ;;  %v1250_v50 = vsel %vm1093_vm2, %v1033_v34, 0.0  ;;  %v1022_v54 = vmul.f32 %v2878_v17, %v3416_v47  ;;  %v851_v62 = vadd.f32 %v3696_v51, %v3353_v9  ;;  %v3778_v6 = vand.u32 127, %v577_v46 }
 0x16c   :  { %1212 = vadd.xlane.f32.xlu1 %v1211_v36  ;;  %v1032_v36 = vmul.f32 %v2868_v29, %v3416_v47  ;;  %v2882_v21 = vpop.eup %2881  ;;  %v1238_v28 = vsel %vm1093_vm2, %v1029_v26, 0.0  ;;  %v850_v46 = vadd.f32 %v3353_v9, %v3729_v30 }
 0x16d   :  { %v2884_v44 = vpop.eup %2883  ;;  %v1217_v5 = vsel %vm1093_vm2, %v1022_v54, 0.0  ;;  %vm1523_vm1 = vcmp.lt.s32.totalorder %v3778_v6, 49 }
 0x16e   :  { %1224 = vadd.xlane.f32.xlu0 %v1223_v45  ;;  %v1031_v45 = vmul.f32 %v2870_v20, %v3416_v47  ;;  %v1247_v19 = vsel %vm1093_vm2, %v1032_v36, 0.0  ;;  %v2886_v49 = vpop.eup %2885 }
 0x16f   :  { %v2888_v37 = vpop.eup %2887 }
 0x170   :  { %1410 = vadd.xlane.f32.xlu1 %v1409_v43  ;;  %v858_v43 = vadd.f32 %v3696_v51, %v3360_v15  ;;  %v2890_v1 = vpop.eup %2889  ;;  %v1067_v23 = vmul.f32 %v2888_v37, %v3416_v47 }
 0x171   :  { %v1036_v20 = vmul.f32 %v2890_v1, %v3416_v47 }
 0x172   :  { %1368 = vadd.xlane.f32.xlu0 %v1367_v33  ;;  %v1244_v33 = vsel %vm1093_vm2, %v1031_v45, 0.0  ;;  %2891 = vtanh.f32 %v858_v43  ;;  %v1352_v36 = vsel %vm1093_vm2, %v1067_v23, 0.0 }
 0x173   :  { %2893 = vtanh.f32 %v816_v52  ;;  %v1259_v45 = vsel %vm1093_vm2, %v1036_v20, 0.0  ;;  %v1640_v52 = vadd.s32 4294967288, %v3778_v6 }
 0x174   :  { %1233 = vadd.xlane.f32.xlu1 %v1232_v60  ;;  %v808_v60 = vadd.f32 %v3549_v12, %v3729_v30 }
 0x176   :  { %1227 = vadd.xlane.f32.xlu0 %v1226_v61  ;;  %v830_v61 = vadd.f32 %v3696_v51, %v3595_v57  ;;  %2895 = vtanh.f32 %v808_v60  ;;  %v822_v51 = vadd.f32 %v3539_v14, %v3729_v30 }
 0x178   :  { %1236 = vadd.xlane.f32.xlu1 %v1235_v59  ;;  %v1039_v59 = vmul.f32 %v2880_v32, %v3416_v47  ;;  %2897 = vtanh.f32 %v830_v61 }
 0x179   :  { %2899 = vtanh.f32 %v815_v3 }
 0x17a   :  { %1230 = vadd.xlane.f32.xlu0 %v1229_v35  ;;  %v1034_v35 = vmul.f32 %v2882_v21, %v3416_v47  ;;  %v1268_v2 = vsel %vm1093_vm2, %v1039_v59, 0.0  ;;  %2901 = vtanh.f32 %v844_v7  ;;  %v3795_v21 = vsub.s32 %v3778_v6, %v3319_v53 }
 0x17b   :  { %2903 = vtanh.f32 %v829_v22  ;;  %v1647_v59 = vadd.s32 4294967280, %v3778_v6 }
 0x17c   :  { %1113 = vadd.xlane.f32.xlu1 %v1112_v13  ;;  %v1053_v13 = vmul.f32 %v2884_v44, %v3416_v47  ;;  %v1253_v4 = vsel %vm1093_vm2, %v1034_v35, 0.0  ;;  %2905 = vtanh.f32 %v851_v62  ;;  %v857_v35 = vadd.f32 %v3360_v15, %v3729_v30 }
 0x17d   :  { %2907 = vtanh.f32 %v843_v18  ;;  %v3812_v30 = vsub.s32 %v1647_v59, %v3319_v53  ;;  %v1654_v62 = vadd.s32 4294967272, %v3778_v6 }
 0x17e   :  { %1215 = vadd.xlane.f32.xlu0 %v1214_v11  ;;  %v1035_v11 = vmul.f32 %v2886_v49, %v3416_v47  ;;  %2909 = vtanh.f32 %v822_v51 }
 0x17f   :  { %v2892_v29 = vpop.eup %2891 }
 0x180   :  { %1242 = vadd.xlane.f32.xlu1 %v1241_v48  ;;  %v1310_v48 = vsel %vm1093_vm2, %v1053_v13, 0.0  ;;  %v1256_v31 = vsel %vm1093_vm2, %v1035_v11, 0.0  ;;  %v1088_v38 = vmul.f32 %v2892_v29, %v3416_v47 }
 0x182   :  { %1134 = vadd.xlane.f32.xlu0 %v1133_v16  ;;  %v3763_v16 = vpop.f32.mrf.mxu1  ;;  %v1415_v43 = vsel %vm1093_vm2, %v1088_v38, 0.0 }
 0x183   :  { %v811_v39 = vadd.f32 %v3763_v16, %v3549_v12  ;;  %v846_v54 = vadd.f32 %v3763_v16, %v3350_v8  ;;  %v853_v22 = vadd.f32 %v3763_v16, %v3353_v9  ;;  %v818_v18 = vadd.f32 %v3763_v16, %v3560_v42 }
 0x184   :  { %1176 = vadd.xlane.f32.xlu1 %v1175_v25  ;;  %v2894_v25 = vpop.eup %2893 }
 0x185   :  { %v1046_v27 = vmul.f32 %v2894_v25, %v3416_v47  ;;  %2911 = vtanh.f32 %v811_v39  ;;  %v860_v39 = vadd.f32 %v3763_v16, %v3360_v15 }
 0x186   :  { %1155 = vadd.xlane.f32.xlu0 %v1154_v40  ;;  %v2896_v40 = vpop.eup %2895  ;;  %2913 = vtanh.f32 %v836_v41 }
 0x187   :  { %v1038_v63 = vmul.f32 %v2896_v40, %v3416_v47  ;;  %v1289_v17 = vsel %vm1093_vm2, %v1046_v27, 0.0 }
 0x188   :  { %1248 = vadd.xlane.f32.xlu1 %v1247_v19  ;;  %v2898_v19 = vpop.eup %2897 }
 0x189   :  { %v2900_v34 = vpop.eup %2899  ;;  %v1265_v32 = vsel %vm1093_vm2, %v1038_v63, 0.0 }
 0x18a   :  { %1245 = vadd.xlane.f32.xlu0 %v1244_v33  ;;  %v825_v33 = vadd.f32 %v3763_v16, %v3539_v14  ;;  %v2902_v26 = vpop.eup %2901 }
 0x18b   :  { %v2904_v61 = vpop.eup %2903 }
 0x18c   :  { %1197 = vadd.xlane.f32.xlu1 %v1196_v56  ;;  %v1060_v56 = vmul.f32 %v2898_v19, %v3416_v47  ;;  %2915 = vtanh.f32 %v825_v33  ;;  %v2906_v7 = vpop.eup %2905  ;;  %v1059_v13 = vmul.f32 %v2904_v61, %v3416_v47  ;;  %v3831_v19 = vsub.s32 %v1654_v62, %v3319_v53 }
 0x18d   :  { %2917 = vtanh.f32 %v850_v46  ;;  %v2908_v37 = vpop.eup %2907  ;;  %v1081_v23 = vmul.f32 %v2906_v7, %v3416_v47 }
 0x18e   :  { %1251 = vadd.xlane.f32.xlu0 %v1250_v50  ;;  %v1045_v50 = vmul.f32 %v2900_v34, %v3416_v47  ;;  %v1331_v44 = vsel %vm1093_vm2, %v1060_v56, 0.0  ;;  %2919 = vtanh.f32 %v846_v54  ;;  %v2910_v29 = vpop.eup %2909  ;;  %v1073_v38 = vmul.f32 %v2908_v37, %v3416_v47 }
 0x18f   :  { %2921 = vtanh.f32 %v857_v35  ;;  %v1394_v63 = vsel %vm1093_vm2, %v1081_v23, 0.0  ;;  %v1052_v33 = vmul.f32 %v2910_v29, %v3416_v47  ;;  %v832_v34 = vadd.f32 %v3763_v16, %v3595_v57 }
 0x190   :  { %1239 = vadd.xlane.f32.xlu1 %v1238_v28  ;;  %v3798_v28 = vsub.s32 %v1640_v52, %v3319_v53  ;;  %2923 = vtanh.f32 %v853_v22 }
 0x191   :  { %2925 = vtanh.f32 %v818_v18 }
 0x192   :  { %1218 = vadd.xlane.f32.xlu0 %v1217_v5  ;;  %v1074_v5 = vmul.f32 %v2902_v26, %v3416_v47  ;;  %v2912_v40 = vpop.eup %2911  ;;  %v1370_v26 = vsel %vm1093_vm2, %v1073_v38, 0.0  ;;  %2927 = vtanh.f32 %v860_v39 }
 0x193   :  { %v2914_v52 = vpop.eup %2913  ;;  %2929 = vtanh.f32 %v832_v34 }
 0x194   :  { %1269 = vadd.xlane.f32.xlu1 %v1268_v2  ;;  %v1286_v2 = vsel %vm1093_vm2, %v1045_v50, 0.0 }
 0x196   :  { %1254 = vadd.xlane.f32.xlu0 %v1253_v4 }
 0x198   :  { %1311 = vadd.xlane.f32.xlu1 %v1310_v48  ;;  %v1373_v48 = vsel %vm1093_vm2, %v1074_v5, 0.0  ;;  %v839_v5 = vadd.f32 %v3763_v16, %v3580_v24 }
 0x199   :  { %v2916_v50 = vpop.eup %2915 }
 0x19a   :  { %1257 = vadd.xlane.f32.xlu0 %v1256_v31  ;;  %v2918_v35 = vpop.eup %2917 }
 0x19c   :  { %1353 = vadd.xlane.f32.xlu1 %v1352_v36  ;;  %v1328_v36 = vsel %vm1093_vm2, %v1059_v13, 0.0 }
 0x19e   :  { %1260 = vadd.xlane.f32.xlu0 %v1259_v45  ;;  %v3826_v45 = vpop.f32.mrf.mxu1 }
 0x1a0   :  { %1416 = vadd.xlane.f32.xlu1 %v1415_v43 }
 0x1a2   :  { %1290 = vadd.xlane.f32.xlu0 %v1289_v17 }
 0x1a3   :  { %v1096_v60 = vpop.xlane.xlu0 %1095 }
 0x1a4   :  { %1266 = vadd.xlane.f32.xlu1 %v1265_v32  ;;  %v1639_v4 = vrot.slane %v1096_v60, %v3795_v21  ;;  %v3843_v60 = vld [vmem:[%s4461_s9] ss:$0 sm:$0xff]  ;;  %v810_v32 = vadd.f32 %v3549_v12, %v3826_v45 }
 0x1a5   :  { %v1117_v3 = vpop.xlane.xlu1 %1116  ;;  %v1041_v47 = vmul.f32 %v3843_v60, %v2912_v40  ;;  %v1055_v37 = vmul.f32 %v3843_v60, %v2916_v50 }
 0x1a6   :  { %1332 = vadd.xlane.f32.xlu0 %v1331_v44  ;;  %v1685_v31 = vrot.slane %v1117_v3, %v3795_v21  ;;  %v1307_v3 = vsel %vm1093_vm2, %v1052_v33, 0.0  ;;  %v1066_v44 = vmul.f32 %v3843_v60, %v2914_v52  ;;  %2931 = vtanh.f32 %v810_v32 }
 0x1a7   :  { %v1099_v49 = vpop.xlane.xlu0 %1098  ;;  %v1274_v22 = vsel %vm1093_vm2, %v1041_v47, 0.0  ;;  %2933 = vtanh.f32 %v839_v5  ;;  %v831_v33 = vadd.f32 %v3595_v57, %v3826_v45 }
 0x1a8   :  { %v1644_v11 = vrot.slane %v1099_v49, %v3798_v28  ;;  %1287 = vadd.xlane.f32.xlu1 %v1286_v2  ;;  %v1668_v49 = vadd.s32 4294967256, %v3778_v6  ;;  %v1661_v2 = vadd.s32 4294967264, %v3778_v6  ;;  %v1349_v62 = vsel %vm1093_vm2, %v1066_v44, 0.0 }
 0x1a9   :  { %v1120_v1 = vpop.xlane.xlu1 %1119 }
 0x1aa   :  { %v1646_v20 = vsel %vm1645_vm3, %v1644_v11, %v1639_v4  ;;  %v1689_v51 = vrot.slane %v1120_v1, %v3798_v28  ;;  %1374 = vadd.xlane.f32.xlu0 %v1373_v48  ;;  %v824_v4 = vadd.f32 %v3539_v14, %v3826_v45  ;;  %v2920_v11 = vpop.eup %2919  ;;  %v1080_v1 = vmul.f32 %v3843_v60, %v2918_v35 }
 0x1ab   :  { %v1102_v25 = vpop.xlane.xlu0 %1101  ;;  %v817_v48 = vadd.f32 %v3560_v42, %v3826_v45  ;;  %v2922_v23 = vpop.eup %2921  ;;  %v3866_v18 = vsub.s32 %v1668_v49, %v3319_v53 }
 0x1ac   :  { %v1690_v27 = vsel %vm1645_vm3, %v1689_v51, %v1685_v31  ;;  %v1651_v41 = vrot.slane %v1102_v25, %v3812_v30  ;;  %1329 = vadd.xlane.f32.xlu1 %v1328_v36  ;;  %v3870_v31 = vsub.s32 %v1661_v2, %v3319_v53  ;;  %v1316_v51 = vsel %vm1093_vm2, %v1055_v37, 0.0  ;;  %v2924_v38 = vpop.eup %2923 }
 0x1ad   :  { %v1123_v43 = vpop.xlane.xlu1 %1122  ;;  %v1076_v25 = vmul.f32 %v3843_v60, %v2920_v11  ;;  %2935 = vtanh.f32 %v824_v4  ;;  %v838_v36 = vadd.f32 %v3580_v24, %v3826_v45  ;;  %v2926_v34 = vpop.eup %2925  ;;  %v1083_v32 = vmul.f32 %v3843_v60, %v2924_v38 }
 0x1ae   :  { %v1653_v17 = vsel %vm1652_vm4, %v1651_v41, %v1646_v20  ;;  %v1694_v56 = vrot.slane %v1123_v43, %v3812_v30  ;;  %1395 = vadd.xlane.f32.xlu0 %v1394_v63  ;;  %v1391_v43 = vsel %vm1093_vm2, %v1080_v1, 0.0  ;;  %v1087_v63 = vmul.f32 %v3843_v60, %v2922_v23  ;;  %v2928_v50 = vpop.eup %2927 }
 0x1af   :  { %v1105_v46 = vpop.xlane.xlu0 %1104  ;;  %2937 = vtanh.f32 %v817_v48  ;;  %v1379_v47 = vsel %vm1093_vm2, %v1076_v25, 0.0  ;;  %v1048_v35 = vmul.f32 %v3843_v60, %v2926_v34  ;;  %v2930_v2 = vpop.eup %2929  ;;  %v1400_v37 = vsel %vm1093_vm2, %v1083_v32, 0.0 }
 0x1b0   :  { %v1695_v54 = vsel %vm1652_vm4, %v1694_v56, %v1690_v27  ;;  %v1658_v61 = vrot.slane %v1105_v46, %v3831_v19  ;;  %1371 = vadd.xlane.f32.xlu1 %v1370_v26  ;;  %v845_v56 = vadd.f32 %v3350_v8, %v3826_v45  ;;  %2939 = vtanh.f32 %v838_v36 }
 0x1b1   :  { %v1141_v59 = vpop.xlane.xlu1 %1140  ;;  %v1412_v5 = vsel %vm1093_vm2, %v1087_v63, 0.0  ;;  %2941 = vtanh.f32 %v831_v33  ;;  %v1090_v4 = vmul.f32 %v3843_v60, %v2928_v50  ;;  %v1295_v23 = vsel %vm1093_vm2, %v1048_v35, 0.0 }
 0x1b2   :  { %v1660_v7 = vsel %vm1659_vm5, %v1658_v61, %v1653_v17  ;;  %1308 = vadd.xlane.f32.xlu0 %v1307_v3  ;;  %v1723_v39 = vrot.slane %v1141_v59, %v3798_v28  ;;  %v852_v3 = vadd.f32 %v3353_v9, %v3826_v45  ;;  %2943 = vtanh.f32 %v845_v56 }
 0x1b3   :  { %v1111_v13 = vpop.xlane.xlu0 %1110  ;;  %v1421_v38 = vsel %vm1093_vm2, %v1090_v4, 0.0 }
 0x1b4   :  { %1275 = vadd.xlane.f32.xlu1 %v1274_v22  ;;  %v1672_v46 = vrot.slane %v1111_v13, %v3866_v18  ;;  %2945 = vtanh.f32 %v852_v3 }
 0x1b5   :  { %v1126_v16 = vpop.xlane.xlu1 %1125 }
 0x1b6   :  { %v1699_v29 = vrot.slane %v1126_v16, %v3831_v19  ;;  %1350 = vadd.xlane.f32.xlu0 %v1349_v62  ;;  %v2932_v16 = vpop.eup %2931 }
 0x1b7   :  { %v1138_v20 = vpop.xlane.xlu0 %1137 }
 0x1b8   :  { %v1700_v40 = vsel %vm1659_vm5, %v1699_v29, %v1695_v54  ;;  %v1719_v27 = vrot.slane %v1138_v20, %v3795_v21  ;;  %1317 = vadd.xlane.f32.xlu1 %v1316_v51  ;;  %v3890_v54 = vpop.f32.mrf.mxu1  ;;  %v1062_v29 = vmul.f32 %v3843_v60, %v2930_v2  ;;  %v859_v20 = vadd.f32 %v3360_v15, %v3826_v45  ;;  %v2934_v51 = vpop.eup %2933 }
 0x1b9   :  { %v1108_v41 = vpop.xlane.xlu1 %1107  ;;  %v813_v11 = vadd.f32 %v3890_v54, %v3549_v12  ;;  %v1069_v63 = vmul.f32 %v3843_v60, %v2934_v51  ;;  %v841_v56 = vadd.f32 %v3890_v54, %v3580_v24 }
 0x1ba   :  { %v1724_v52 = vsel %vm1645_vm3, %v1723_v39, %v1719_v27  ;;  %v1665_v17 = vrot.slane %v1108_v41, %v3870_v31  ;;  %1392 = vadd.xlane.f32.xlu0 %v1391_v43  ;;  %v1040_v39 = vmul.f32 %v3843_v60, %v2932_v16  ;;  %v834_v27 = vadd.f32 %v3890_v54, %v3595_v57  ;;  %v2936_v41 = vpop.eup %2935 }
 0x1bb   :  { %v1144_v26 = vpop.xlane.xlu0 %1143  ;;  %2947 = vtanh.f32 %v813_v11  ;;  %v1337_v45 = vsel %vm1093_vm2, %v1062_v29, 0.0 }
 0x1bc   :  { %v1667_v61 = vsel %vm1666_vm6, %v1665_v17, %v1660_v7  ;;  %v1728_v59 = vrot.slane %v1144_v26, %v3812_v30  ;;  %1380 = vadd.xlane.f32.xlu1 %v1379_v47  ;;  %2949 = vtanh.f32 %v859_v20  ;;  %v2938_v33 = vpop.eup %2937  ;;  %v1054_v17 = vmul.f32 %v3843_v60, %v2936_v41  ;;  %v3936_v47 = vpop.f32.mrf.mxu1 }
 0x1bd   :  { %v1147_v44 = vpop.xlane.xlu1 %1146  ;;  %v3899_v49 = vsel %vm1673_vm7, %v1672_v46, %v1667_v61  ;;  %2951 = vtanh.f32 %v834_v27  ;;  %v2940_v46 = vpop.eup %2939  ;;  %v827_v26 = vadd.f32 %v3890_v54, %v3539_v14  ;;  %v1358_v61 = vsel %vm1093_vm2, %v1069_v63, 0.0 }
 0x1be   :  { %v1729_v13 = vsel %vm1652_vm4, %v1728_v59, %v1724_v52  ;;  %v1733_v7 = vrot.slane %v1147_v44, %v3831_v19  ;;  %1413 = vadd.xlane.f32.xlu0 %v1412_v5  ;;  %v1271_v52 = vsel %vm1093_vm2, %v1040_v39, 0.0  ;;  %v1047_v59 = vmul.f32 %v3843_v60, %v2938_v33  ;;  %v2942_v3 = vpop.eup %2941 }
 0x1bf   :  { %v1129_v22 = vpop.xlane.xlu0 %1128  ;;  %v848_v44 = vadd.f32 %v3890_v54, %v3350_v8  ;;  %v1313_v2 = vsel %vm1093_vm2, %v1054_v17, 0.0  ;;  %v840_v41 = vadd.f32 %v3580_v24, %v3936_v47 }
 0x1c0   :  { %v3908_v62 = vsel %vm1659_vm5, %v1733_v7, %v1729_v13  ;;  %v1704_v1 = vrot.slane %v1129_v22, %v3870_v31  ;;  %1401 = vadd.xlane.f32.xlu1 %v1400_v37  ;;  %v1068_v13 = vmul.f32 %v3843_v60, %v2940_v46  ;;  %v2944_v7 = vpop.eup %2943  ;;  %v819_v37 = vadd.f32 %v3560_v42, %v3936_v47 }
 0x1c1   :  { %v1180_v48 = vpop.xlane.xlu1 %1179  ;;  %v1292_v16 = vsel %vm1093_vm2, %v1047_v59, 0.0  ;;  %v826_v46 = vadd.f32 %v3539_v14, %v3936_v47 }
 0x1c2   :  { %v3916_v25 = vsel %vm1666_vm6, %v1704_v1, %v1700_v40  ;;  %1296 = vadd.xlane.f32.xlu0 %v1295_v23  ;;  %v820_v40 = vadd.f32 %v3890_v54, %v3560_v42  ;;  %v1787_v5 = vrot.slane %v1180_v48, %v3795_v21  ;;  %v1061_v1 = vmul.f32 %v3843_v60, %v2942_v3  ;;  %v2946_v48 = vpop.eup %2945 }
 0x1c3   :  { %v1183_v36 = vpop.xlane.xlu0 %1182  ;;  %v1355_v51 = vsel %vm1093_vm2, %v1068_v13, 0.0  ;;  %v812_v42 = vadd.f32 %v3549_v12, %v3936_v47  ;;  %v847_v3 = vadd.f32 %v3350_v8, %v3936_v47  ;;  %v833_v13 = vadd.f32 %v3595_v57, %v3936_v47 }
 0x1c4   :  { %1422 = vadd.xlane.f32.xlu1 %v1421_v38  ;;  %v1791_v32 = vrot.slane %v1183_v36, %v3798_v28  ;;  %2953 = vtanh.f32 %v820_v40  ;;  %v1075_v36 = vmul.f32 %v3843_v60, %v2944_v7  ;;  %v1334_v63 = vsel %vm1093_vm2, %v1061_v1, 0.0 }
 0x1c5   :  { %v3922_v43 = vpop.xlane.xlu1 %1131  ;;  %2955 = vtanh.f32 %v841_v56  ;;  %v1082_v40 = vmul.f32 %v3843_v60, %v2946_v48 }
 0x1c6   :  { %1338 = vadd.xlane.f32.xlu0 %v1337_v45  ;;  %v1792_v4 = vsel %vm1645_vm3, %v1791_v32, %v1787_v5  ;;  %2957 = vtanh.f32 %v827_v26  ;;  %v1376_v17 = vsel %vm1093_vm2, %v1075_v36, 0.0 }
 0x1c7   :  { %v3928_v34 = vpop.xlane.xlu0 %1149  ;;  %2959 = vtanh.f32 %v848_v44 }
 0x1c8   :  { %1272 = vadd.xlane.f32.xlu1 %v1271_v52  ;;  %v2948_v38 = vpop.eup %2947  ;;  %2961 = vtanh.f32 %v819_v37 }
 0x1c9   :  { %v3939_v50 = vpop.xlane.xlu1 %1152  ;;  %v2950_v33 = vpop.eup %2949  ;;  %v1043_v56 = vmul.f32 %v3843_v60, %v2948_v38  ;;  %2963 = vtanh.f32 %v812_v42  ;;  %v861_v38 = vadd.f32 %v3360_v15, %v3936_v47 }
 0x1ca   :  { %1359 = vadd.xlane.f32.xlu0 %v1358_v61  ;;  %v2952_v24 = vpop.eup %2951  ;;  %2965 = vtanh.f32 %v840_v41  ;;  %v1397_v61 = vsel %vm1093_vm2, %v1082_v40, 0.0  ;;  %v1089_v59 = vmul.f32 %v3843_v60, %v2950_v33 }
 0x1cb   :  { %v1186_v35 = vpop.xlane.xlu0 %1185  ;;  %2967 = vtanh.f32 %v826_v46 }
 0x1cc   :  { %v1796_v22 = vrot.slane %v1186_v35, %v3812_v30  ;;  %1314 = vadd.xlane.f32.xlu1 %v1313_v2  ;;  %v1280_v35 = vsel %vm1093_vm2, %v1043_v56, 0.0  ;;  %v1064_v2 = vmul.f32 %v3843_v60, %v2952_v24  ;;  %v1418_v8 = vsel %vm1093_vm2, %v1089_v59, 0.0 }
 0x1cd   :  { %v1189_v11 = vpop.xlane.xlu1 %1188  ;;  %2969 = vtanh.f32 %v847_v3 }
 0x1ce   :  { %v1797_v23 = vsel %vm1652_vm4, %v1796_v22, %v1792_v4  ;;  %v1801_v29 = vrot.slane %v1189_v11, %v3831_v19  ;;  %1293 = vadd.xlane.f32.xlu0 %v1292_v16  ;;  %v854_v4 = vadd.f32 %v3353_v9, %v3936_v47  ;;  %v1343_v1 = vsel %vm1093_vm2, %v1064_v2, 0.0 }
 0x1cf   :  { %v1192_v20 = vpop.xlane.xlu0 %1191  ;;  %2971 = vtanh.f32 %v833_v13 }
 0x1d0   :  { %v1802_v39 = vsel %vm1659_vm5, %v1801_v29, %v1797_v23  ;;  %v1806_v27 = vrot.slane %v1192_v20, %v3870_v31  ;;  %1356 = vadd.xlane.f32.xlu1 %v1355_v51  ;;  %v855_v23 = vadd.f32 %v3890_v54, %v3353_v9  ;;  %2973 = vtanh.f32 %v854_v4 }
 0x1d1   :  { %v3964_v45 = vpop.xlane.xlu1 %1158  ;;  %v2954_v44 = vpop.eup %2953 }
 0x1d2   :  { %v1807_v52 = vsel %vm1666_vm6, %v1806_v27, %v1802_v39  ;;  %1335 = vadd.xlane.f32.xlu0 %v1334_v63  ;;  %v2956_v7 = vpop.eup %2955  ;;  %v1050_v37 = vmul.f32 %v3843_v60, %v2954_v44  ;;  %2975 = vtanh.f32 %v855_v23  ;;  %v862_v63 = vadd.f32 %v3890_v54, %v3360_v15 }
 0x1d3   :  { %v1195_v12 = vpop.xlane.xlu0 %1194  ;;  %v2958_v11 = vpop.eup %2957  ;;  %v1071_v48 = vmul.f32 %v3843_v60, %v2956_v7  ;;  %2977 = vtanh.f32 %v861_v38  ;;  %v1753_v46 = vrot.slane %v3964_v45, %v3795_v21 }
 0x1d4   :  { %v1811_v26 = vrot.slane %v1195_v12, %v3866_v18  ;;  %1377 = vadd.xlane.f32.xlu1 %v1376_v17  ;;  %v2960_v29 = vpop.eup %2959  ;;  %v1301_v36 = vsel %vm1093_vm2, %v1050_v37, 0.0  ;;  %v1057_v42 = vmul.f32 %v3843_v60, %v2958_v11  ;;  %2979 = vtanh.f32 %v862_v63 }
 0x1d5   :  { %v3974_v32 = vpop.xlane.xlu1 %1305  ;;  %v2962_v20 = vpop.eup %2961  ;;  %v1364_v41 = vsel %vm1093_vm2, %v1071_v48, 0.0  ;;  %v1078_v9 = vmul.f32 %v3843_v60, %v2960_v29 }
 0x1d6   :  { %v3981_v5 = vsel %vm1673_vm7, %v1811_v26, %v1807_v52  ;;  %1398 = vadd.xlane.f32.xlu0 %v1397_v61  ;;  %v2964_v40 = vpop.eup %2963  ;;  %v1049_v33 = vmul.f32 %v3843_v60, %v2962_v20  ;;  %v1322_v47 = vsel %vm1093_vm2, %v1057_v42, 0.0 }
 0x1d7   :  { %v3983_v14 = vpop.xlane.xlu0 %1263  ;;  %v2966_v52 = vpop.eup %2965  ;;  %v1385_v15 = vsel %vm1093_vm2, %v1078_v9, 0.0  ;;  %v1042_v54 = vmul.f32 %v3843_v60, %v2964_v40 }
 0x1d8   :  { %1281 = vadd.xlane.f32.xlu1 %v1280_v35  ;;  %v2968_v26 = vpop.eup %2967  ;;  %v1298_v59 = vsel %vm1093_vm2, %v1049_v33, 0.0  ;;  %v1070_v3 = vmul.f32 %v3843_v60, %v2966_v52 }
 0x1d9   :  { %v1168_v22 = vpop.xlane.xlu1 %1167  ;;  %v1056_v37 = vmul.f32 %v3843_v60, %v2968_v26 }
 0x1da   :  { %1419 = vadd.xlane.f32.xlu0 %v1418_v8  ;;  %v2970_v2 = vpop.eup %2969  ;;  %v1277_v8 = vsel %vm1093_vm2, %v1042_v54, 0.0  ;;  %v1361_v11 = vsel %vm1093_vm2, %v1070_v3, 0.0 }
 0x1db   :  { %v3993_v16 = vpop.xlane.xlu0 %1284  ;;  %v2690_v57 = vpop.f32.mrf.mxu0  ;;  %v1319_v23 = vsel %vm1093_vm2, %v1056_v37, 0.0 }
 0x1dc   :  { %1344 = vadd.xlane.f32.xlu1 %v1343_v1  ;;  %v1508_v45 = vadd.f32 %v2690_v57, %v3321_v55  ;;  %v1077_v1 = vmul.f32 %v3843_v60, %v2970_v2 }
 0x1dd   :  { %v3999_v51 = vpop.xlane.xlu1 %1200  ;;  %v1502_v39 = vpop.f32.mrf.mxu0 }
 0x1de   :  { %1302 = vadd.xlane.f32.xlu0 %v1301_v36  ;;  %v1503_v56 = vadd.f32 %v1502_v39, %v3328_v58  ;;  %v1767_v58 = vrot.slane %v1168_v22, %v3831_v19  ;;  %v2972_v22 = vpop.eup %2971  ;;  %v1382_v42 = vsel %vm1093_vm2, %v1077_v1, 0.0 }
 0x1df   :  { %v1162_v27 = vpop.xlane.xlu0 %1161  ;;  %v2974_v48 = vpop.eup %2973  ;;  %v1063_v29 = vmul.f32 %v3843_v60, %v2972_v22  ;;  %v1675_v22 = vadd.s32 4294967248, %v3778_v6 }
 0x1e0   :  { %1365 = vadd.xlane.f32.xlu1 %v1364_v41  ;;  %v1757_v12 = vrot.slane %v1162_v27, %v3798_v28  ;;  %2981 = vtanh.f32 %v1503_v56  ;;  %v2976_v20 = vpop.eup %2975  ;;  %v1084_v38 = vmul.f32 %v3843_v60, %v2974_v48 }
 0x1e1   :  { %v4011_v17 = vpop.xlane.xlu1 %1347  ;;  %2983 = vtanh.f32 %v1508_v45  ;;  %v2978_v39 = vpop.eup %2977  ;;  %v1340_v41 = vsel %vm1093_vm2, %v1063_v29, 0.0  ;;  %v1085_v9 = vmul.f32 %v3843_v60, %v2976_v20  ;;  %v4081_v48 = vsub.s32 %v1675_v22, %v3319_v53 }
 0x1e2   :  { %1323 = vadd.xlane.f32.xlu0 %v1322_v47  ;;  %v1758_v44 = vsel %vm1645_vm3, %v1757_v12, %v1753_v46  ;;  %v2980_v63 = vpop.eup %2979  ;;  %v1403_v33 = vsel %vm1093_vm2, %v1084_v38, 0.0  ;;  %v1091_v52 = vmul.f32 %v3843_v60, %v2978_v39  ;;  %v1738_v20 = vrot.slane %v3928_v34, %v3870_v31 }
 0x1e3   :  { %v1165_v24 = vpop.xlane.xlu0 %1164  ;;  %v1406_v56 = vsel %vm1093_vm2, %v1085_v9, 0.0  ;;  %v1092_v46 = vmul.f32 %v3843_v60, %v2980_v63 }
 0x1e4   :  { %v1762_v61 = vrot.slane %v1165_v24, %v3812_v30  ;;  %1386 = vadd.xlane.f32.xlu1 %v1385_v15  ;;  %v1424_v15 = vsel %vm1093_vm2, %v1091_v52, 0.0  ;;  %v1739_v63 = vsel %vm1666_vm6, %v1738_v20, %v3908_v62 }
 0x1e5   :  { %v4025_v35 = vpop.xlane.xlu1 %1221 }
 0x1e6   :  { %v1763_v13 = vsel %vm1652_vm4, %v1762_v61, %v1758_v44  ;;  %1299 = vadd.xlane.f32.xlu0 %v1298_v59  ;;  %v1427_v59 = vsel %vm1093_vm2, %v1092_v46, 0.0 }
 0x1e7   :  { %v4028_v7 = vpop.xlane.xlu0 %1326  ;;  %v4033_v4 = vsel %vm1659_vm5, %v1767_v58, %v1763_v13 }
 0x1e8   :  { %1278 = vadd.xlane.f32.xlu1 %v1277_v8 }
 0x1e9   :  { %v4035_v55 = vpop.xlane.xlu1 %1173 }
 0x1ea   :  { %1362 = vadd.xlane.f32.xlu0 %v1361_v11 }
 0x1eb   :  { %v4039_v57 = vpop.xlane.xlu0 %1203 }
 0x1ec   :  { %1320 = vadd.xlane.f32.xlu1 %v1319_v23  ;;  %v1709_v23 = vrot.slane %v3922_v43, %v3866_v18  ;;  %v1743_v43 = vrot.slane %v3939_v50, %v3866_v18  ;;  %v1777_v50 = vrot.slane %v4035_v55, %v3866_v18  ;;  %v1821_v55 = vrot.slane %v3999_v51, %v3795_v21 }
 0x1ed   :  { %v4043_v36 = vpop.xlane.xlu1 %1209  ;;  %v2982_v12 = vpop.eup %2981 }
 0x1ee   :  { %1383 = vadd.xlane.f32.xlu0 %v1382_v42  ;;  %v1513_v54 = vmul.f32 %v3843_v60, %v2982_v12  ;;  %v2984_v26 = vpop.eup %2983  ;;  %v1710_v53 = vsel %vm1673_vm7, %v1709_v23, %v3916_v25  ;;  %v1744_v62 = vsel %vm1673_vm7, %v1743_v43, %v1739_v63 }
 0x1ef   :  { %v1171_v27 = vpop.xlane.xlu0 %1170  ;;  %v1514_v44 = vmul.f32 %v3843_v60, %v2984_v26 }
 0x1f0   :  { %1341 = vadd.xlane.f32.xlu1 %v1340_v41  ;;  %v1515_v58 = vsel %vm1093_vm2, %v1513_v54, 0.0  ;;  %v1772_v38 = vrot.slane %v1171_v27, %v3870_v31 }
 0x1f1   :  { %v4049_v40 = vpop.xlane.xlu1 %1389  ;;  %v1518_v13 = vsel %vm1093_vm2, %v1514_v44, 0.0  ;;  %vm2217_vm2 = vcmask 457728  }
 0x1f2   :  { %1404 = vadd.xlane.f32.xlu0 %v1403_v33  ;;  %v1773_v33 = vsel %vm1666_vm6, %v1772_v38, %v4033_v4 }
 0x1f3   :  { %v4053_v47 = vpop.xlane.xlu0 %1206 }
 0x1f4   :  { %1407 = vadd.xlane.f32.xlu1 %v1406_v56  ;;  %v1830_v4 = vrot.slane %v4053_v47, %v3812_v30 }
 0x1f5   :  { %v4057_v24 = vpop.xlane.xlu1 %1212 }
 0x1f6   :  { %1425 = vadd.xlane.f32.xlu0 %v1424_v15  ;;  %v1778_v15 = vsel %vm1673_vm7, %v1777_v50, %v1773_v33  ;;  %v1840_v51 = vrot.slane %v4057_v24, %v3870_v31 }
 0x1f7   :  { %v4061_v61 = vpop.xlane.xlu0 %1224 }
 0x1f8   :  { %1428 = vadd.xlane.f32.xlu1 %v1427_v59 }
 0x1f9   :  { %v4064_v3 = vpop.xlane.xlu1 %1410 }
 0x1fa   :  { %1516 = vadd.xlane.f32.xlu0 %v1515_v58 }
 0x1fb   :  { %v4068_v45 = vpop.xlane.xlu0 %1368 }
 0x1fd   :  { %v4070_v2 = vpop.xlane.xlu1 %1233 }
 0x1fe   :  { %1519 = vadd.xlane.f32.xlu0 %v1518_v13 }
 0x1ff   :  { %v4073_v8 = vpop.xlane.xlu0 %1227 }
 0x200   :  { %v1864_v24 = vrot.slane %v4073_v8, %v3812_v30 }
 0x201   :  { %v4075_v37 = vpop.xlane.xlu1 %1236 }
 0x203   :  { %v4078_v11 = vpop.xlane.xlu0 %1230 }
 0x205   :  { %v1114_v1 = vpop.xlane.xlu1 %1113 }
 0x206   :  { %v1679_v42 = vrot.slane %v1114_v1, %v4081_v48  ;;  %v1835_v1 = vrot.slane %v4043_v36, %v3831_v19  ;;  %v1859_v36 = vrot.slane %v4061_v61, %v3798_v28 }
 0x207   :  { %v1216_v60 = vpop.xlane.xlu0 %1215 }
 0x208   :  { %v1681_v34 = vsel %vm1680_vm8, %v1679_v42, %v3899_v49  ;;  %v1825_v49 = vrot.slane %v4039_v57, %v3798_v28  ;;  %v1845_v38 = vrot.slane %v1216_v60, %v3866_v18  ;;  %v1855_v60 = vrot.slane %v4025_v35, %v3795_v21 }
 0x209   :  { %v4085_v29 = vpop.xlane.xlu1 %1242 }
 0x20a   :  { %v1826_v57 = vsel %vm1645_vm3, %v1825_v49, %v1821_v55 }
 0x20b   :  { %v1135_v39 = vpop.xlane.xlu0 %1134  ;;  %v1831_v22 = vsel %vm1652_vm4, %v1830_v4, %v1826_v57 }
 0x20c   :  { %v1714_v41 = vrot.slane %v1135_v39, %v4081_v48  ;;  %v1836_v42 = vsel %vm1659_vm5, %v1835_v1, %v1831_v22 }
 0x20d   :  { %v1177_v9 = vpop.xlane.xlu1 %1176  ;;  %v1841_v43 = vsel %vm1666_vm6, %v1840_v51, %v1836_v42 }
 0x20e   :  { %v1715_v27 = vsel %vm1680_vm8, %v1714_v41, %v1710_v53  ;;  %v1782_v12 = vrot.slane %v1177_v9, %v4081_v48 }
 0x20f   :  { %v2193_v52 = vsel %vm2192_vm9, %v1715_v27, %v1681_v34  ;;  %v1156_v25 = vpop.xlane.xlu0 %1155  ;;  %v1869_v34 = vrot.slane %v4078_v11, %v3831_v19  ;;  %v1874_v11 = vrot.slane %v4070_v2, %v3870_v31  ;;  %v1879_v2 = vrot.slane %v4075_v37, %v3866_v18 }
 0x210   :  { %v1748_v56 = vrot.slane %v1156_v25, %v4081_v48  ;;  %v1783_v26 = vsel %vm1680_vm8, %v1782_v12, %v1778_v15  ;;  %v1860_v12 = vsel %vm1645_vm3, %v1859_v36, %v1855_v60  ;;  %v1889_v25 = vrot.slane %v4085_v29, %v3795_v21 }
 0x211   :  { %v1249_v46 = vpop.xlane.xlu1 %1248  ;;  %v1865_v8 = vsel %vm1652_vm4, %v1864_v24, %v1860_v12  ;;  %v1957_v60 = vrot.slane %v3993_v16, %v3795_v21 }
 0x212   :  { %v1749_v54 = vsel %vm1680_vm8, %v1748_v56, %v1744_v62  ;;  %v1870_v35 = vsel %vm1659_vm5, %v1869_v34, %v1865_v8  ;;  %v1898_v4 = vrot.slane %v1249_v46, %v3812_v30 }
 0x213   :  { %v2195_v59 = vsel %vm2194_vm10, %v1749_v54, %v2193_v52  ;;  %v1246_v58 = vpop.xlane.xlu0 %1245  ;;  %v1875_v54 = vsel %vm1666_vm6, %v1874_v11, %v1870_v35 }
 0x214   :  { %v2197_v44 = vsel %vm2196_vm11, %v1783_v26, %v2195_v59  ;;  %v1893_v33 = vrot.slane %v1246_v58, %v3798_v28  ;;  %v1880_v46 = vsel %vm1673_vm7, %v1879_v2, %v1875_v54 }
 0x215   :  { %v1198_v13 = vpop.xlane.xlu1 %1197 }
 0x216   :  { %v1816_v47 = vrot.slane %v1198_v13, %v4081_v48  ;;  %v1894_v56 = vsel %vm1645_vm3, %v1893_v33, %v1889_v25 }
 0x217   :  { %v1252_v23 = vpop.xlane.xlu0 %1251  ;;  %v1899_v59 = vsel %vm1652_vm4, %v1898_v4, %v1894_v56  ;;  %v2093_v56 = vrot.slane %v4068_v45, %v3795_v21 }
 0x218   :  { %v1817_v20 = vsel %vm1680_vm8, %v1816_v47, %v3981_v5  ;;  %v1846_v5 = vsel %vm1673_vm7, %v1845_v38, %v1841_v43  ;;  %v1903_v62 = vrot.slane %v1252_v23, %v3831_v19 }
 0x219   :  { %v2199_v39 = vsel %vm2198_vm12, %v1817_v20, %v2197_v44  ;;  %v1240_v41 = vpop.xlane.xlu1 %1239 }
 0x21a   :  { %v1884_v29 = vrot.slane %v1240_v41, %v4081_v48  ;;  %v1904_v58 = vsel %vm1659_vm5, %v1903_v62, %v1899_v59  ;;  %v1923_v41 = vrot.slane %v3983_v14, %v3795_v21 }
 0x21b   :  { %v1219_v53 = vpop.xlane.xlu0 %1218 }
 0x21c   :  { %v1850_v9 = vrot.slane %v1219_v53, %v4081_v48  ;;  %v1885_v22 = vsel %vm1680_vm8, %v1884_v29, %v1880_v46 }
 0x21d   :  { %v1270_v63 = vpop.xlane.xlu1 %1269 }
 0x21e   :  { %v1851_v27 = vsel %vm1680_vm8, %v1850_v9, %v1846_v5  ;;  %v1932_v43 = vrot.slane %v1270_v63, %v3812_v30 }
 0x21f   :  { %v2201_v61 = vsel %vm2200_vm13, %v1851_v27, %v2199_v39  ;;  %v1255_v52 = vpop.xlane.xlu0 %1254 }
 0x220   :  { %v1908_v15 = vrot.slane %v1255_v52, %v3870_v31  ;;  %v2203_v23 = vsel %vm2202_vm14, %v1885_v22, %v2201_v61  ;;  %v2025_v52 = vrot.slane %v4028_v7, %v3795_v21  ;;  %v1991_v7 = vrot.slane %v3974_v32, %v3795_v21 }
 0x221   :  { %v4150_v50 = vpop.xlane.xlu1 %1311 }
 0x222   :  { %v1909_v57 = vsel %vm1666_vm6, %v1908_v15, %v1904_v58  ;;  %v2000_v29 = vrot.slane %v4150_v50, %v3812_v30 }
 0x223   :  { %v1258_v49 = vpop.xlane.xlu0 %1257 }
 0x224   :  { %v1913_v55 = vrot.slane %v1258_v49, %v3866_v18 }
 0x225   :  { %v4162_v26 = vpop.xlane.xlu1 %1353 }
 0x226   :  { %v1914_v47 = vsel %vm1673_vm7, %v1913_v55, %v1909_v57  ;;  %v2068_v46 = vrot.slane %v4162_v26, %v3812_v30 }
 0x227   :  { %v1261_v44 = vpop.xlane.xlu0 %1260 }
 0x228   :  { %v1918_v13 = vrot.slane %v1261_v44, %v4081_v48  ;;  %v2059_v44 = vrot.slane %v4011_v17, %v3795_v21 }
 0x229   :  { %v4173_v1 = vpop.xlane.xlu1 %1416 }
 0x22a   :  { %v1919_v37 = vsel %vm1680_vm8, %v1918_v13, %v1914_v47  ;;  %v2127_v47 = vrot.slane %v4049_v40, %v3795_v21  ;;  %v2170_v40 = vrot.slane %v4173_v1, %v3812_v30 }
 0x22b   :  { %v1291_v51 = vpop.xlane.xlu0 %1290  ;;  %v2205_v20 = vsel %vm2204_vm15, %v1919_v37, %v2203_v23 }
 0x22c   :  { %v4181_v42 = vsel %vm1523_vm1, %v2205_v20, -1e+30  ;;  %v1966_v27 = vrot.slane %v1291_v51, %v3812_v30 }
 0x22d   :  { %v1267_v38 = vpop.xlane.xlu1 %1266  ;;  %v2218_v39 = vsel %vm2217_vm2, %v4181_v42, -inf }
 0x22e   :  { %v1927_v53 = vrot.slane %v1267_v38, %v3798_v28  ;;  %2219 = vmax.xlane.f32.xlu1 %v2218_v39  ;;  %v2161_v38 = vrot.slane %v4064_v3, %v3795_v21 }
 0x22f   :  { %v1333_v36 = vpop.xlane.xlu0 %1332 }
 0x230   :  { %v1928_v9 = vsel %vm1645_vm3, %v1927_v53, %v1923_v41  ;;  %v2034_v8 = vrot.slane %v1333_v36, %v3812_v30 }
 0x231   :  { %v1288_v24 = vpop.xlane.xlu1 %1287  ;;  %v4191_v5 = vsel %vm1652_vm4, %v1932_v43, %v1928_v9 }
 0x232   :  { %v1961_v34 = vrot.slane %v1288_v24, %v3798_v28 }
 0x233   :  { %v1375_v14 = vpop.xlane.xlu0 %1374 }
 0x234   :  { %v1962_v33 = vsel %vm1645_vm3, %v1961_v34, %v1957_v60  ;;  %v2102_v49 = vrot.slane %v1375_v14, %v3812_v30 }
 0x235   :  { %v1330_v61 = vpop.xlane.xlu1 %1329  ;;  %v1967_v63 = vsel %vm1652_vm4, %v1966_v27, %v1962_v33 }
 0x236   :  { %v2029_v12 = vrot.slane %v1330_v61, %v3798_v28 }
 0x237   :  { %v1396_v25 = vpop.xlane.xlu0 %1395 }
 0x238   :  { %v2030_v16 = vsel %vm1645_vm3, %v2029_v12, %v2025_v52  ;;  %v2136_v17 = vrot.slane %v1396_v25, %v3812_v30 }
 0x239   :  { %v1372_v35 = vpop.xlane.xlu1 %1371  ;;  %v4205_v11 = vsel %vm1652_vm4, %v2034_v8, %v2030_v16 }
 0x23a   :  { %v2097_v62 = vrot.slane %v1372_v35, %v3798_v28 }
 0x23b   :  { %v1309_v4 = vpop.xlane.xlu0 %1308 }
 0x23c   :  { %v2098_v15 = vsel %vm1645_vm3, %v2097_v62, %v2093_v56  ;;  %v1995_v54 = vrot.slane %v1309_v4, %v3798_v28 }
 0x23d   :  { %v1276_v55 = vpop.xlane.xlu1 %1275  ;;  %v4218_v2 = vsel %vm1652_vm4, %v2102_v49, %v2098_v15 }
 0x23e   :  { %v1996_v45 = vsel %vm1645_vm3, %v1995_v54, %v1991_v7  ;;  %v1942_v54 = vrot.slane %v1276_v55, %v3870_v31 }
 0x23f   :  { %v1351_v59 = vpop.xlane.xlu0 %1350  ;;  %v2001_v58 = vsel %vm1652_vm4, %v2000_v29, %v1996_v45 }
 0x240   :  { %v2063_v32 = vrot.slane %v1351_v59, %v3798_v28 }
 0x241   :  { %v4227_v57 = vpop.xlane.xlu1 %1317 }
 0x242   :  { %v2064_v50 = vsel %vm1645_vm3, %v2063_v32, %v2059_v44 }
 0x243   :  { %v1393_v13 = vpop.xlane.xlu0 %1392  ;;  %v4231_v22 = vsel %vm1652_vm4, %v2068_v46, %v2064_v50 }
 0x244   :  { %v2131_v37 = vrot.slane %v1393_v13, %v3798_v28 }
 0x245   :  { %v4237_v23 = vpop.xlane.xlu1 %1380 }
 0x246   :  { %v2132_v51 = vsel %vm1645_vm3, %v2131_v37, %v2127_v47 }
 0x247   :  { %v1414_v26 = vpop.xlane.xlu0 %1413  ;;  %v4241_v20 = vsel %vm1652_vm4, %v2136_v17, %v2132_v51  ;;  %v2010_v17 = vrot.slane %v4227_v57, %v3870_v31  ;;  %v2112_v51 = vrot.slane %v4237_v23, %v3870_v31 }
 0x248   :  { %v2165_v39 = vrot.slane %v1414_v26, %v3798_v28 }
 0x249   :  { %v4248_v41 = vpop.xlane.xlu1 %1401 }
 0x24a   :  { %v2166_v53 = vsel %vm1645_vm3, %v2165_v39, %v2161_v38  ;;  %vm3111_vm3 = vmmov 0  }
 0x24b   :  { %v1297_v43 = vpop.xlane.xlu0 %1296  ;;  %v4252_v36 = vsel %vm1652_vm4, %v2170_v40, %v2166_v53  ;;  %vm2497_vm4 = vcmp.eq.s32.totalorder %v3778_v6, 49 }
 0x24c   :  { %v1976_v62 = vrot.slane %v1297_v43, %v3870_v31 }
 0x24d   :  { %v4254_v9 = vpop.xlane.xlu1 %1422 }
 0x24f   :  { %v4256_v24 = vpop.xlane.xlu0 %1338 }
 0x251   :  { %v1273_v60 = vpop.xlane.xlu1 %1272 }
 0x252   :  { %v1937_v16 = vrot.slane %v1273_v60, %v3831_v19 }
 0x253   :  { %v1360_v34 = vpop.xlane.xlu0 %1359 }
 0x254   :  { %v1938_v4 = vsel %vm1659_vm5, %v1937_v16, %v4191_v5  ;;  %v2078_v40 = vrot.slane %v1360_v34, %v3870_v31 }
 0x255   :  { %v1315_v21 = vpop.xlane.xlu1 %1314  ;;  %v1943_v5 = vsel %vm1666_vm6, %v1942_v54, %v1938_v4 }
 0x256   :  { %v2005_v7 = vrot.slane %v1315_v21, %v3831_v19 }
 0x257   :  { %v1294_v3 = vpop.xlane.xlu0 %1293 }
 0x258   :  { %v1971_v8 = vrot.slane %v1294_v3, %v3831_v19  ;;  %v2006_v13 = vsel %vm1659_vm5, %v2005_v7, %v2001_v58 }
 0x259   :  { %v1357_v28 = vpop.xlane.xlu1 %1356  ;;  %v2011_v21 = vsel %vm1666_vm6, %v2010_v17, %v2006_v13 }
 0x25a   :  { %v1972_v56 = vsel %vm1659_vm5, %v1971_v8, %v1967_v63  ;;  %v2073_v63 = vrot.slane %v1357_v28, %v3831_v19 }
 0x25b   :  { %v1336_v27 = vpop.xlane.xlu0 %1335  ;;  %v1977_v29 = vsel %vm1666_vm6, %v1976_v62, %v1972_v56 }
 0x25c   :  { %v2039_v55 = vrot.slane %v1336_v27, %v3831_v19  ;;  %v2074_v60 = vsel %vm1659_vm5, %v2073_v63, %v4231_v22  ;;  %v2146_v22 = vrot.slane %v4248_v41, %v3870_v31  ;;  %v2180_v63 = vrot.slane %v4254_v9, %v3870_v31 }
 0x25d   :  { %v1378_v14 = vpop.xlane.xlu1 %1377 }
 0x25e   :  { %v2107_v47 = vrot.slane %v1378_v14, %v3831_v19  ;;  %v2040_v28 = vsel %vm1659_vm5, %v2039_v55, %v4205_v11 }
 0x25f   :  { %v1399_v30 = vpop.xlane.xlu0 %1398 }
 0x260   :  { %v2141_v58 = vrot.slane %v1399_v30, %v3831_v19  ;;  %v2108_v34 = vsel %vm1659_vm5, %v2107_v47, %v4218_v2  ;;  %v2044_v30 = vrot.slane %v4256_v24, %v3870_v31  ;;  %v2079_v2 = vsel %vm1666_vm6, %v2078_v40, %v2074_v60 }
 0x261   :  { %v1282_v1 = vpop.xlane.xlu1 %1281  ;;  %v2113_v56 = vsel %vm1666_vm6, %v2112_v51, %v2108_v34  ;;  %v3110_v60 = vmov 0.0   ;;  %v3008_v34 = vld [vmem:[%s4455_s3 + $0x18] sm:$0xff] }
 0x262   :  { %v1952_v32 = vrot.slane %v1282_v1, %v4081_v48  ;;  %v2142_v11 = vsel %vm1659_vm5, %v2141_v58, %v4241_v20  ;;  %2691 = vmatprep.subr.mxu0 %v3110_v60  ;;  %2705 = vmatprep.mubr.msk.f32.mxu0 %vm3111_vm3, %v3110_v60 }
 0x263   :  { %v4258_v33 = vpop.xlane.xlu0 %1419  ;;  %v2147_v54 = vsel %vm1666_vm6, %v2146_v22, %v2142_v11  ;;  %2708 = vmatprep.subr.mxu1 %v3110_v60  ;;  %v3011_v22 = vld [vmem:[%s4455_s3 + $0x48] sm:$0xff]  ;;  %2722 = vmatprep.mubr.msk.f32.mxu1 %vm3111_vm3, %v3110_v60 }
 0x264   :  { %v2175_v1 = vrot.slane %v4258_v33, %v3831_v19  ;;  %v2045_v19 = vsel %vm1666_vm6, %v2044_v30, %v2040_v28  ;;  %v3007_v28 = vld [vmem:[%s4455_s3 + $0x58] sm:$0xff]  ;;  %v3012_v30 = vld [vmem:[%s4455_s3 + $0x8] sm:$0xff] }
 0x265   :  { %v4260_v61 = vpop.xlane.xlu1 %1344 }
 0x266   :  { %v2054_v41 = vrot.slane %v4260_v61, %v4081_v48  ;;  %v2176_v7 = vsel %vm1659_vm5, %v2175_v1, %v4252_v36  ;;  %v3013_v1 = vld [vmem:[%s4455_s3 + $0x40] sm:$0xff] }
 0x267   :  { %v1303_v52 = vpop.xlane.xlu0 %1302  ;;  %v2181_v13 = vsel %vm1666_vm6, %v2180_v63, %v2176_v7 }
 0x268   :  { %v1986_v46 = vrot.slane %v1303_v52, %v4081_v48 }
 0x269   :  { %v4262_v12 = vpop.xlane.xlu1 %1365 }
 0x26a   :  { %v2088_v62 = vrot.slane %v4262_v12, %v4081_v48 }
 0x26b   :  { %v1324_v25 = vpop.xlane.xlu0 %1323 }
 0x26c   :  { %v2020_v57 = vrot.slane %v1324_v25, %v4081_v48 }
 0x26d   :  { %v4266_v35 = vpop.xlane.xlu1 %1386 }
 0x26e   :  { %v2122_v61 = vrot.slane %v4266_v35, %v4081_v48 }
 0x26f   :  { %v1300_v49 = vpop.xlane.xlu0 %1299 }
 0x270   :  { %v1981_v15 = vrot.slane %v1300_v49, %v3866_v18 }
 0x271   :  { %v1279_v45 = vpop.xlane.xlu1 %1278 }
 0x272   :  { %v1982_v59 = vsel %vm1673_vm7, %v1981_v15, %v1977_v29  ;;  %v1947_v44 = vrot.slane %v1279_v45, %v3866_v18 }
 0x273   :  { %v1363_v50 = vpop.xlane.xlu0 %1362  ;;  %v1987_v26 = vsel %vm1680_vm8, %v1986_v46, %v1982_v59 }
 0x274   :  { %v1948_v37 = vsel %vm1673_vm7, %v1947_v44, %v1943_v5  ;;  %v2083_v23 = vrot.slane %v1363_v50, %v3866_v18 }
 0x275   :  { %v1953_v38 = vsel %vm1680_vm8, %v1952_v32, %v1948_v37  ;;  %v1321_v39 = vpop.xlane.xlu1 %1320 }
 0x276   :  { %v2206_v53 = vsel %vm2192_vm9, %v1987_v26, %v1953_v38  ;;  %v2015_v43 = vrot.slane %v1321_v39, %v3866_v18  ;;  %v2084_v24 = vsel %vm1673_vm7, %v2083_v23, %v2079_v2  ;;  %v3004_v23 = vld [vmem:[%s4455_s3 + $0x28] sm:$0xff] }
 0x277   :  { %v1384_v3 = vpop.xlane.xlu0 %1383  ;;  %v2089_v45 = vsel %vm1680_vm8, %v2088_v62, %v2084_v24 }
 0x278   :  { %v2016_v27 = vsel %vm1673_vm7, %v2015_v43, %v2011_v21  ;;  %v2117_v14 = vrot.slane %v1384_v3, %v3866_v18  ;;  %v3005_v21 = vld [vmem:[%s4455_s3 + $0x60] sm:$0xff] }
 0x279   :  { %v2021_v52 = vsel %vm1680_vm8, %v2020_v57, %v2016_v27  ;;  %v1342_v8 = vpop.xlane.xlu1 %1341  ;;  %v3003_v57 = vld [vmem:[%s4455_s3 + $0x68] sm:$0xff]  ;;  %v3006_v3 = vld [vmem:[%s4455_s3 + $0x20] sm:$0xff]  ;;  %v3009_v27 = vld [vmem:[%s4455_s3 + $0x50] sm:$0xff] }
 0x27a   :  { %v2207_v25 = vsel %vm2194_vm10, %v2021_v52, %v2206_v53  ;;  %v2049_v16 = vrot.slane %v1342_v8, %v3866_v18  ;;  %v2118_v20 = vsel %vm1673_vm7, %v2117_v14, %v2113_v56  ;;  %2709 = vmatpush3.msra.mxu1 %v3003_v57  ;;  %v3010_v14 = vld [vmem:[%s4455_s3 + $0x10] sm:$0xff]  ;;  %v3014_v52 = vld [vmem:[%s4455_s3] sm:$0xff]  ;;  %v3015_v8 = vld [vmem:[%s4455_s3 + $0x38] sm:$0xff] }
 0x27b   :  { %v1405_v33 = vpop.xlane.xlu0 %1404  ;;  %v2123_v36 = vsel %vm1680_vm8, %v2122_v61, %v2118_v20  ;;  %2710 = vmatprep.subr.mxu1 %v3110_v60 }
 0x27c   :  { %v2050_v49 = vsel %vm1673_vm7, %v2049_v16, %v2045_v19  ;;  %v2151_v4 = vrot.slane %v1405_v33, %v3866_v18  ;;  %2711 = vmatpush3.msra.mxu1 %v3005_v21 }
 0x27d   :  { %v2055_v15 = vsel %vm1680_vm8, %v2054_v41, %v2050_v49  ;;  %v1408_v29 = vpop.xlane.xlu1 %1407  ;;  %2712 = vmatprep.subr.mxu1 %v3110_v60 }
 0x27e   :  { %v2208_v12 = vsel %vm2196_vm11, %v2055_v15, %v2207_v25  ;;  %v2152_v59 = vsel %vm1673_vm7, %v2151_v4, %v2147_v54  ;;  %v2156_v44 = vrot.slane %v1408_v29, %v4081_v48  ;;  %2713 = vmatpush3.msra.mxu1 %v3007_v28 }
 0x27f   :  { %v1426_v32 = vpop.xlane.xlu0 %1425  ;;  %v2209_v35 = vsel %vm2198_vm12, %v2089_v45, %v2208_v12  ;;  %2714 = vmatprep.subr.mxu1 %v3110_v60  ;;  %v127_v45 = vld [vmem:[%s4462_s10 + $0x18] sm:$0xff] }
 0x280   :  { %v2157_v46 = vsel %vm1680_vm8, %v2156_v44, %v2152_v59  ;;  %v2185_v5 = vrot.slane %v1426_v32, %v3866_v18  ;;  %v2210_v50 = vsel %vm2200_vm13, %v2123_v36, %v2209_v35  ;;  %2715 = vmatpush3.msra.mxu1 %v3009_v27 }
 0x281   :  { %v1429_v55 = vpop.xlane.xlu1 %1428  ;;  %v2211_v47 = vsel %vm2202_vm14, %v2157_v46, %v2210_v50  ;;  %2716 = vmatprep.subr.mxu1 %v3110_v60  ;;  %v125_v50 = vld [vmem:[%s4462_s10 + $0x8] sm:$0xff] }
 0x282   :  { %v2186_v37 = vsel %vm1673_vm7, %v2185_v5, %v2181_v13  ;;  %v2190_v31 = vrot.slane %v1429_v55, %v4081_v48  ;;  %2717 = vmatpush3.msra.mxu1 %v3011_v22  ;;  %v126_v5 = vld [vmem:[%s4462_s10 + $0x10] sm:$0xff]  ;;  %v124_v13 = vld [vmem:[%s4462_s10] sm:$0xff] }
 0x283   :  { %v4358_v26 = vpop.xlane.xlu0 %1516  ;;  %2718 = vmatprep.subr.mxu1 %v3110_v60 }
 0x284   :  { %v2191_v9 = vsel %vm1680_vm8, %v2190_v31, %v2186_v37  ;;  %2719 = vmatpush3.msra.mxu1 %v3013_v1 }
 0x285   :  { %v2212_v17 = vsel %vm2204_vm15, %v2191_v9, %v2211_v47  ;;  %2720 = vmatprep.subr.mxu1 %v3110_v60 }
 0x286   :  { %v4354_v51 = vsel %vm1523_vm1, %v2212_v17, -1e+30  ;;  %2721 = vmatpush3.msra.mxu1 %v3015_v8  ;;  %v3016_v17 = vld [vmem:[#allocation5] sm:$0xff] }
 0x287   :  { %v2221_v18 = vsel %vm2217_vm2, %v4354_v51, -inf  ;;  %v1520_v11 = vpop.xlane.xlu0 %1519 }
 0x288   :  { %2222 = vmax.xlane.f32.xlu1 %v2221_v18 }
 0x2b7   :  { %v2220_v38 = vpop.xlane.xlu1 %2219 }
 0x2b8   :  { %v4361_v39 = vmax.f32 %v2220_v38, %v4358_v26 }
 0x2ba   :  { %v2226_v48 = vsub.f32 %v4181_v42, %v4361_v39  ;;  %v2232_v40 = vsub.f32 %v4358_v26, %v4361_v39  ;;  %v3002_v42 = vld [vmem:[%s4455_s3 + $0x30] sm:$0xff] }
 0x2bb   :  { %2692 = vmatpush3.msra.mxu0 %v3002_v42 }
 0x2bc   :  { %v2228_v58 = vmul.f32 1.442695, %v2226_v48  ;;  %2693 = vmatprep.subr.mxu0 %v3110_v60  ;;  %v2234_v19 = vmul.f32 1.442695, %v2232_v40 }
 0x2bd   :  { %2694 = vmatpush3.msra.mxu0 %v3004_v23 }
 0x2be   :  { %2985 = vpow2.f32 %v2228_v58  ;;  %2695 = vmatprep.subr.mxu0 %v3110_v60  ;;  %v3017_v58 = vld [vmem:[#allocation5 + $0x8] sm:$0xff] }
 0x2bf   :  { %2696 = vmatpush3.msra.mxu0 %v3006_v3 }
 0x2c0   :  { %2697 = vmatprep.subr.mxu0 %v3110_v60 }
 0x2c1   :  { %2698 = vmatpush3.msra.mxu0 %v3008_v34 }
 0x2c2   :  { %2699 = vmatprep.subr.mxu0 %v3110_v60 }
 0x2c3   :  { %2700 = vmatpush3.msra.mxu0 %v3010_v14 }
 0x2c4   :  { %2701 = vmatprep.subr.mxu0 %v3110_v60 }
 0x2c5   :  { %2702 = vmatpush3.msra.mxu0 %v3012_v30 }
 0x2c6   :  { %2703 = vmatprep.subr.mxu0 %v3110_v60 }
 0x2c7   :  { %2704 = vmatpush3.msra.mxu0 %v3014_v52 }
 0x2c8   :  { %2725 = vmatprep.subr.mxu0 %v127_v45 }
 0x2cb   :  { %v4367_v53 = vpop.eup %2985 }
 0x2cc   :  { %v2238_v43 = vsel %vm2217_vm2, %v4367_v53, 0.0 }
 0x2cd   :  { %2239 = vadd.xlane.f32.xlu0 %v2238_v43 }
 0x311   :  { %v2223_v2 = vpop.xlane.xlu1 %2222 }
 0x312   :  { %v2225_v25 = vmax.f32 %v2223_v2, %v1520_v11 }
 0x314   :  { %v2227_v16 = vsub.f32 %v4354_v51, %v2225_v25  ;;  %v2233_v54 = vsub.f32 %v1520_v11, %v2225_v25 }
 0x316   :  { %v2230_v41 = vmul.f32 1.442695, %v2227_v16  ;;  %v2236_v29 = vmul.f32 1.442695, %v2233_v54 }
 0x318   :  { %2987 = vpow2.f32 %v2230_v41 }
 0x319   :  { %2989 = vpow2.f32 %v2234_v19 }
 0x325   :  { %v2988_v24 = vpop.eup %2987 }
 0x326   :  { %v2241_v56 = vsel %vm2217_vm2, %v2988_v24, 0.0  ;;  %v2990_v33 = vpop.eup %2989 }
 0x327   :  { %2242 = vadd.xlane.f32.xlu1 %v2241_v56 }
 0x356   :  { %v2240_v62 = vpop.xlane.xlu0 %2239 }
 0x357   :  { %2991 = vrcp.f32 %v2240_v62  ;;  %v2246_v20 = vadd.f32 %v2990_v33, %v2240_v62 }
 0x359   :  { %2993 = vrcp.f32 %v2246_v20 }
 0x35a   :  { %2995 = vpow2.f32 %v2236_v29 }
 0x364   :  { %v2992_v49 = vpop.eup %2991 }
 0x365   :  { %v2250_v4 = vmul.f32 %v2992_v49, %v4367_v53 }
 0x366   :  { %v2994_v7 = vpop.eup %2993 }
 0x367   :  { %2706 = vmatmul.mubr.msk.f32.vlgmr.msra.gmra.mxu0 %vm2217_vm2, %v2250_v4  ;;  %v2252_v61 = vmul.f32 %v2994_v7, %v2990_v33  ;;  %v2996_v12 = vpop.eup %2995 }
 0x368   :  { %2726 = vmatpush3.msra.mxu0 %v127_v45 }
 0x369   :  { %v2498_v15 = vsel %vm2497_vm4, %v2252_v61, %v2250_v4  ;;  %2727 = vmatprep.subr.mxu0 %v126_v5  ;;  %v2402_v6 = vsub.f32 1.0, %v2252_v61  ;;  %v2400_v47 = vmul.f32 %v2252_v61, %v3433_v0  ;;  %v2551_v0 = vld [vmem:[%s4463_s11] ss:$0 sm:$0xff] }
 0x36a   :  { %2728 = vmatpush3.msra.mxu0 %v126_v5  ;;  %v2500_v21 = vsel %vm2217_vm2, %v2498_v15, 0.0 }
 0x36b   :  { %2729 = vmatprep.subr.mxu0 %v125_v50 }
 0x36c   :  { %2730 = vmatpush3.msra.mxu0 %v125_v50 }
 0x36d   :  { %2731 = vmatprep.subr.mxu0 %v124_v13 }
 0x36e   :  { %2732 = vmatpush3.msra.mxu0 %v124_v13 }
 0x3b0   :  { %v2243_v59 = vpop.xlane.xlu1 %2242 }
 0x3b1   :  { %2997 = vrcp.f32 %v2243_v59  ;;  %v2247_v44 = vadd.f32 %v2996_v12, %v2243_v59 }
 0x3b3   :  { %2999 = vrcp.f32 %v2247_v44 }
 0x3be   :  { %v2998_v63 = vpop.eup %2997 }
 0x3bf   :  { %v2251_v36 = vmul.f32 %v2998_v63, %v2988_v24 }
 0x3c0   :  { %v3000_v32 = vpop.eup %2999 }
 0x3c1   :  { %2723 = vmatmul.mubr.msk.f32.vlgmr.msra.gmra.mxu1 %vm2217_vm2, %v2251_v36  ;;  %v2253_v35 = vmul.f32 %v3000_v32, %v2996_v12 }
 0x3c3   :  { %v2499_v46 = vsel %vm2497_vm4, %v2253_v35, %v2251_v36  ;;  %v2403_v18 = vsub.f32 1.0, %v2253_v35  ;;  %v2401_v38 = vmul.f32 %v2253_v35, %v3443_v10 }
 0x3c4   :  { %v2501_v42 = vsel %vm2217_vm2, %v2499_v46, 0.0 }
 0x427   :  { %v2323_v55 = vpop.f32.mrf.mxu0 }
 0x428   :  { %v2404_v37 = vmul.f32 %v2402_v6, %v2323_v55 }
 0x429   :  { %v2707_v31 = vpop.f32.mrf.mxu0 }
 0x42a   :  { %v2406_v9 = vadd.f32 %v2404_v37, %v2400_v47 }
 0x42c   :  { %v2408_v51 = vadd.f32 %v3016_v17, %v2406_v9 }
 0x42e   :  { %2733 = vmatprep.mubr.msk.f32.mxu0 %vm129_vm0, %v2408_v51 }
 0x481   :  { %v2396_v26 = vpop.f32.mrf.mxu1 }
 0x482   :  { %v2405_v39 = vmul.f32 %v2403_v18, %v2396_v26 }
 0x483   :  { %v2724_v48 = vpop.f32.mrf.mxu1 }
 0x484   :  { %v2407_v40 = vadd.f32 %v2405_v39, %v2401_v38 }
 0x486   :  { %v2409_v53 = vadd.f32 %v3017_v58, %v2407_v40 }
 0x488   :  { %2734 = vmatmul.mubr.msk.f32.vlgmr.msra.gmra.mxu0 %vm129_vm0, %v2409_v53 }
 0x548   :  { %v2735_v43 = vpop.f32.mrf.mxu0 }
 0x549   :  { %v2494_v60 = vadd.f32 %v2735_v43, %v2551_v0 }
 0x54a   :  { %v2488_v57 = vpop.f32.mrf.mxu0 }
 0x54b   :  { %v2503_v23 = vadd.f32 %v2501_v42, %v2494_v60  ;;  %v2489_v10 = vadd.f32 %v2551_v0, %v2488_v57 }
 0x54d   :  { %2505 = vst [vmem:[#allocation8 + $0x8] sm:$0xff] %v2503_v23  ;;  %v2502_v3 = vadd.f32 %v2500_v21, %v2489_v10 }
 0x54f   :  { %2504 = vst [vmem:[#allocation8] sm:$0xff] %v2502_v3 }
 0x550   :  { %3089 = shalt.err (!%p3086_p5)
}
 0x551   :  { %2517 = dma.vmem_to_hbm [thread:$0]  %s2512_s7, 256, %s4464_s12, [#allocation4], %s3106_s26, %s3106_s26, %s3107_s27  }
 0x552   :  { %3102 = dma.done.wait [#allocation4], 256  }
 0x553   :  { %3103 = vsyncadd [#allocation4], 4294967040 }
 0x554   :  { %2521 = vsyncpa [#allocation3], 1 }
 0x555   :  { %2522 = vsyncpa [#allocation6], 1 }
 0x556   :  { %2523 = vsyncpa [#allocation4], 1 }

</bundles_post_ra>
